<compile_context>
chip_gen: v6e
topology: v6e:2x2x1
jax: 0.10.0
libtpu: 0.0.40
codegen_flags: <defaults>
</compile_context>

<pallas_src>
import functools

import jax
import jax.numpy as jnp
from jax.experimental import pallas as pl
from jax.experimental.pallas import tpu as pltpu


def _rup(v, m):
    return (v + m - 1) // m * m


def _cdiv(a, b):
    return -(-a // b)


def _conv_bn_act_kernel(x_ref, w_ref, b_ref, o_ref, *, chunks, m_tile, cin, act):
    """One (batch, cout-tile, m-tile) grid step.

    x_ref: (1, S2, Lq, Cin)   stride-factored, spatially-flattened padded image (resident per n)
    w_ref: (T*Cin, tn)        (tap x in-channel)-flattened block-diagonal weights, BN folded in
    b_ref: (1, tn)            folded BN (+conv) bias
    o_ref: (1, m_tile, tn)    lane-dense output tile
    """
    mi = pl.program_id(2)
    m0 = pl.multiple_of(mi * m_tile, 8)

    acc = None
    for k0, chunk in chunks:
        parts = [x_ref[0, plane, pl.ds(m0 + off, m_tile), :] for plane, off in chunk]
        lhs = parts[0] if len(parts) == 1 else jnp.concatenate(parts, axis=-1)
        rhs = w_ref[pl.ds(k0, len(chunk) * cin), :]
        contrib = jnp.dot(lhs, rhs, preferred_element_type=jnp.float32)
        acc = contrib if acc is None else acc + contrib

    acc = acc + b_ref[...]
    if act == "relu":
        acc = jnp.maximum(acc, 0.0)
    elif act == "silu":
        # sigmoid via EUP tanh (no VALU divide): sigmoid(x) = 0.5*(tanh(x/2)+1)
        acc = acc * (0.5 * (jnp.tanh(0.5 * acc) + 1.0))
    # act is None -> identity
    o_ref[0] = acc.astype(o_ref.dtype)


def conv_module_forward(x_in, weight, conv_bias, bn_params, *, stride, padding, groups,
                        act, eps=1e-5, compute_dtype=jnp.bfloat16,
                        nhwc_in=False, nhwc_out=False):
    """Forward of ConvModule.  x_in: (N, Cin, H, W) (or NHWC if nhwc_in)."""
    if nhwc_in:
        N, H, W, Cin = x_in.shape
        x = x_in
    else:
        N, Cin, H, W = x_in.shape
        x = jnp.transpose(x_in, (0, 2, 3, 1))                   # (N, H, W, Cin)
    out_dtype = x_in.dtype

    Cout, Cin_g, KH, KW = weight.shape
    G = groups
    Cout_g = Cout // G
    s = int(stride)
    Ho = (H + 2 * padding - KH) // s + 1
    Wo = (W + 2 * padding - KW) // s + 1

    qh_max = (KH - 1) // s
    qw_max = (KW - 1) // s
    Wq = Wo + qw_max
    S2 = s * s
    T = KH * KW
    LANE = 128
    Cout_pad = _rup(Cout, LANE)

    # ---- output row (M) and Cout tiling ----
    m_out = Ho * Wq                         # rows per image (Wq-Wo garbage cols sliced off later)
    MAX_M_TILE = 512
    m_tile = min(MAX_M_TILE, _rup(m_out, 8))
    m_tiles = _cdiv(m_out, m_tile)
    M_pad = m_tiles * m_tile
    tn = 256 if Cout_pad % 256 == 0 else 128
    cout_tiles = Cout_pad // tn

    # flat-plane rows needed so every tap slice of every m-tile stays in bounds
    max_off = qh_max * Wq + qw_max
    Hq = _cdiv(M_pad + max_off, Wq)
    Lq = Hq * Wq
    Hp2, Wp2 = Hq * s, Wq * s

    # ---- input: single spatial pad/crop, stride-factor, flatten over (Hq, Wq) ----
    pad_b = max(Hp2 - (H + padding), 0)
    pad_r = max(Wp2 - (W + padding), 0)
    x = jnp.pad(x, ((0, 0), (padding, pad_b), (padding, pad_r), (0, 0)))
    x = x[:, :Hp2, :Wp2, :]
    if s == 1:
        x = x.reshape(N, 1, Lq, Cin)                             # fast path: pure reshape
    else:
        x = x.reshape(N, Hq, s, Wq, s, Cin)
        x = jnp.transpose(x, (0, 2, 4, 1, 3, 5)).reshape(N, S2, Lq, Cin)
    x = x.astype(compute_dtype)

    # ---- fold eval-mode BN into per-channel scale/bias; fold scale into the weights ----
    if bn_params is not None:
        gamma, beta, mean, var = bn_params
        scale = gamma / jnp.sqrt(var + eps)
        bias = beta - mean * scale
        if conv_bias is not None:
            bias = bias + conv_bias * scale
    else:
        scale = jnp.ones((Cout,), jnp.float32)
        bias = conv_bias if conv_bias is not None else jnp.zeros((Cout,), jnp.float32)

    w = weight.astype(jnp.float32) * scale[:, None, None, None]  # (Cout, Cin_g, KH, KW)
    # block-diagonal over groups, K ordered as (tap, original input channel)
    w = w.reshape(G, Cout_g, Cin_g, KH, KW)
    w = jnp.transpose(w, (3, 4, 0, 2, 1)).reshape(T, G, Cin_g, Cout_g)
    eye = jnp.eye(G, dtype=w.dtype)
    w_bd = jnp.einsum('tgio,gh->tgiho', w, eye).reshape(T, Cin, Cout)
    w_k = jnp.pad(w_bd, ((0, 0), (0, 0), (0, Cout_pad - Cout)))
    w_k = w_k.reshape(T * Cin, Cout_pad).astype(compute_dtype)   # taps folded into K

    b = jnp.pad(bias.astype(jnp.float32), (0, Cout_pad - Cout)).reshape(1, Cout_pad)

    # tap -> (stride-plane index, constant flat row offset); chunk taps into the matmul K dim
    taps = []
    for kh in range(KH):
        for kw in range(KW):
            qh, rh = divmod(kh, s)
            qw, rw = divmod(kw, s)
            taps.append((rh * s + rw, qh * Wq + qw))
    K_FOLD_MAX = 2048
    # Lane-aligned Cin: concatenate tap slices along lanes -> one big-K matmul per chunk.
    tap_per_chunk = max(1, K_FOLD_MAX // Cin) if Cin % LANE == 0 else 1
    chunks = tuple((i * Cin, tuple(taps[i:i + tap_per_chunk]))
                   for i in range(0, T, tap_per_chunk))

    # ---- VMEM budget (sized per generation) ----
    isz = jnp.dtype(compute_dtype).itemsize
    osz = jnp.dtype(out_dtype).itemsize
    x_blk = S2 * _rup(Lq, 8) * _rup(Cin, LANE) * isz
    w_blk = _rup(T * Cin, 8) * tn * isz
    b_blk = 8 * tn * 4
    o_blk = _rup(m_tile, 8) * tn * osz
    need = 2 * (x_blk + w_blk + b_blk + o_blk)                   # double-buffered blocks
    need += m_tile * tn * 4                                      # f32 value accumulator
    need += m_tile * _rup(min(tap_per_chunk * Cin, T * Cin), LANE) * isz  # folded LHS value
    need += 2 * 1024 * 1024                                      # headroom
    try:
        cap = int(getattr(pltpu.get_tpu_info(), "vmem_capacity_bytes", 64 * 1024 * 1024))
    except Exception:
        cap = 64 * 1024 * 1024
    vmem_limit = int(min(max(need, 32 * 1024 * 1024), int(0.85 * cap)))

    cost = pl.CostEstimate(
        flops=int(2 * N * Ho * Wo * Cout * Cin_g * KH * KW),
        transcendentals=int(N * Ho * Wo * Cout) if act == "silu" else 0,
        bytes_accessed=int(x.size * isz + w_k.size * isz + b.size * 4
                           + N * M_pad * Cout_pad * osz))

    kernel = functools.partial(_conv_bn_act_kernel, chunks=chunks, m_tile=m_tile,
                               cin=Cin, act=act)
    out = pl.pallas_call(
        kernel,
        out_shape=jax.ShapeDtypeStruct((N, M_pad, Cout_pad), out_dtype),
        grid_spec=pltpu.PrefetchScalarGridSpec(
            num_scalar_prefetch=0,
            grid=(N, cout_tiles, m_tiles),
            in_specs=[
                # whole padded image stays resident per batch element (index constant in ci/mi)
                pl.BlockSpec((1, S2, Lq, Cin), lambda n, ci, mi: (n, 0, 0, 0)),
                # weight / bias tiles stay resident across the inner m-tile loop
                pl.BlockSpec((T * Cin, tn), lambda n, ci, mi: (0, ci)),
                pl.BlockSpec((1, tn), lambda n, ci, mi: (0, ci)),
            ],
            out_specs=pl.BlockSpec((1, m_tile, tn), lambda n, ci, mi: (n, mi, ci)),
        ),
        compiler_params=pltpu.CompilerParams(
            dimension_semantics=("parallel", "parallel", "parallel"),
            vmem_limit_bytes=vmem_limit),
        cost_estimate=cost,
    )(x, w_k, b)

    # (N, M_pad, Cout_pad) -> drop row padding, garbage ow columns, channel padding
    out = out[:, :m_out, :].reshape(N, Ho, Wq, Cout_pad)[:, :, :Wo, :Cout]
    if nhwc_out:
        return out
    return jnp.transpose(out, (0, 3, 1, 2))


if __name__ == "__main__":
    # ConvModule(in_channels=4, out_channels=8, kernel_size=3, stride=1,
    #            padding=1, groups=2, norm_cfg={'type': 'BN'}, act_cfg={'type': 'SiLU'})
    N, Cin, H, W = 2, 4, 16, 16
    Cout, KH, stride, padding, groups = 8, 3, 1, 1, 2

    key = jax.random.PRNGKey(0)
    k1, k2, k3, k4, k5, k6 = jax.random.split(key, 6)
    x = jax.random.normal(k1, (N, Cin, H, W), jnp.float32)
    weight = jax.random.normal(k2, (Cout, Cin // groups, KH, KH), jnp.float32) * 0.1
    gamma = 1.0 + 0.1 * jax.random.normal(k3, (Cout,), jnp.float32)
    beta = 0.1 * jax.random.normal(k4, (Cout,), jnp.float32)
    run_mean = 0.1 * jax.random.normal(k5, (Cout,), jnp.float32)
    run_var = jax.random.uniform(k6, (Cout,), jnp.float32, minval=0.5, maxval=1.5)
    bn = (gamma, beta, run_mean, run_var)

    # pure-JAX reference (eval-mode BN + SiLU)
    y_conv = jax.lax.conv_general_dilated(
        x, weight, window_strides=(stride, stride),
        padding=((padding, padding), (padding, padding)),
        dimension_numbers=("NCHW", "OIHW", "NCHW"),
        feature_group_count=groups)
    s_ref = gamma / jnp.sqrt(run_var + 1e-5)
    b_ref = beta - run_mean * s_ref
    y_ref = y_conv * s_ref[None, :, None, None] + b_ref[None, :, None, None]
    y_ref = y_ref * jax.nn.sigmoid(y_ref)

    # f32 compute path (tight numerics check)
    y32 = conv_module_forward(x, weight, None, bn, stride=stride, padding=padding,
                              groups=groups, act="silu", compute_dtype=jnp.float32)
    y32 = jax.block_until_ready(y32)
    assert y32.shape == (N, Cout, H, W)
    assert jnp.allclose(y32, y_ref, atol=5e-4, rtol=5e-4), \
        float(jnp.max(jnp.abs(y32 - y_ref)))

    # default bf16 compute path (production default; f32 MXU accumulation)
    ybf = conv_module_forward(x, weight, None, bn, stride=stride, padding=padding,
                              groups=groups, act="silu")
    ybf = jax.block_until_ready(ybf)
    assert ybf.shape == (N, Cout, H, W)
    assert jnp.allclose(ybf, y_ref, atol=5e-2, rtol=5e-2), \
        float(jnp.max(jnp.abs(ybf - y_ref)))

    print("KERNEL_OK")
</pallas_src>

<mosaic_0001>
module attributes {stable_mosaic.version = 11 : i64} {
  func.func @_conv_bn_act_kernel(%arg0: i32, %arg1: i32, %arg2: i32, %arg3: memref<1x1x342x4xf32, #tpu.memory_space<vmem>>, %arg4: memref<36x128xf32, #tpu.memory_space<vmem>>, %arg5: memref<1x128xf32, #tpu.memory_space<vmem>>, %arg6: memref<1x288x128xf32, #tpu.memory_space<vmem>>) attributes {dimension_semantics = [#tpu.dimension_semantics<parallel>, #tpu.dimension_semantics<parallel>, #tpu.dimension_semantics<parallel>], iteration_bounds = array<i64: 2, 1, 1>, scalar_prefetch = 0 : i64, scratch_operands = 0 : i64, tpu.core_type = #tpu.core_type<tc>, window_params = [{transform_indices = @transform_0, window_bounds = array<i64: 1, 1, 342, 4>}, {transform_indices = @transform_1, window_bounds = array<i64: 36, 128>}, {transform_indices = @transform_2, window_bounds = array<i64: 1, 128>}, {transform_indices = @transform_3, window_bounds = array<i64: 1, 288, 128>}]} {
    %c288_i32 = arith.constant 288 : i32
    %0 = arith.muli %arg2, %c288_i32 : i32
    %1 = tpu.assume_multiple %0, 8 : i32
    %c0_i32 = arith.constant 0 : i32
    %2 = arith.addi %1, %c0_i32 : i32
    %c0 = arith.constant 0 : index
    %c0_0 = arith.constant 0 : index
    %3 = arith.index_cast %2 : i32 to index
    %c0_1 = arith.constant 0 : index
    %4 = vector.load %arg3[%c0, %c0_0, %3, %c0_1] : memref<1x1x342x4xf32, #tpu.memory_space<vmem>>, vector<1x1x288x4xf32>
    %5 = vector.shape_cast %4 : vector<1x1x288x4xf32> to vector<288x4xf32>
    %c0_2 = arith.constant 0 : index
    %c0_3 = arith.constant 0 : index
    %6 = vector.load %arg4[%c0_2, %c0_3] : memref<36x128xf32, #tpu.memory_space<vmem>>, vector<4x128xf32>
    %cst = arith.constant dense<0.000000e+00> : vector<288x128xf32>
    %7 = tpu.matmul %5, %6, %cst {dimension_numbers = #tpu.dot_dimension_numbers<[1], [0], [0], [1], [0, 0, 1, 1], [], []>} : vector<288x4xf32>, vector<4x128xf32>, vector<288x128xf32> -> vector<288x128xf32>
    %c1_i32 = arith.constant 1 : i32
    %8 = arith.addi %1, %c1_i32 : i32
    %c0_4 = arith.constant 0 : index
    %c0_5 = arith.constant 0 : index
    %9 = arith.index_cast %8 : i32 to index
    %c0_6 = arith.constant 0 : index
    %10 = vector.load %arg3[%c0_4, %c0_5, %9, %c0_6] : memref<1x1x342x4xf32, #tpu.memory_space<vmem>>, vector<1x1x288x4xf32>
    %11 = vector.shape_cast %10 : vector<1x1x288x4xf32> to vector<288x4xf32>
    %c4 = arith.constant 4 : index
    %c0_7 = arith.constant 0 : index
    %12 = vector.load %arg4[%c4, %c0_7] : memref<36x128xf32, #tpu.memory_space<vmem>>, vector<4x128xf32>
    %cst_8 = arith.constant dense<0.000000e+00> : vector<288x128xf32>
    %13 = tpu.matmul %11, %12, %cst_8 {dimension_numbers = #tpu.dot_dimension_numbers<[1], [0], [0], [1], [0, 0, 1, 1], [], []>} : vector<288x4xf32>, vector<4x128xf32>, vector<288x128xf32> -> vector<288x128xf32>
    %14 = arith.addf %7, %13 : vector<288x128xf32>
    %c2_i32 = arith.constant 2 : i32
    %15 = arith.addi %1, %c2_i32 : i32
    %c0_9 = arith.constant 0 : index
    %c0_10 = arith.constant 0 : index
    %16 = arith.index_cast %15 : i32 to index
    %c0_11 = arith.constant 0 : index
    %17 = vector.load %arg3[%c0_9, %c0_10, %16, %c0_11] : memref<1x1x342x4xf32, #tpu.memory_space<vmem>>, vector<1x1x288x4xf32>
    %18 = vector.shape_cast %17 : vector<1x1x288x4xf32> to vector<288x4xf32>
    %c8 = arith.constant 8 : index
    %c0_12 = arith.constant 0 : index
    %19 = vector.load %arg4[%c8, %c0_12] : memref<36x128xf32, #tpu.memory_space<vmem>>, vector<4x128xf32>
    %cst_13 = arith.constant dense<0.000000e+00> : vector<288x128xf32>
    %20 = tpu.matmul %18, %19, %cst_13 {dimension_numbers = #tpu.dot_dimension_numbers<[1], [0], [0], [1], [0, 0, 1, 1], [], []>} : vector<288x4xf32>, vector<4x128xf32>, vector<288x128xf32> -> vector<288x128xf32>
    %21 = arith.addf %14, %20 : vector<288x128xf32>
    %c18_i32 = arith.constant 18 : i32
    %22 = arith.addi %1, %c18_i32 : i32
    %c0_14 = arith.constant 0 : index
    %c0_15 = arith.constant 0 : index
    %23 = arith.index_cast %22 : i32 to index
    %c0_16 = arith.constant 0 : index
    %24 = vector.load %arg3[%c0_14, %c0_15, %23, %c0_16] : memref<1x1x342x4xf32, #tpu.memory_space<vmem>>, vector<1x1x288x4xf32>
    %25 = vector.shape_cast %24 : vector<1x1x288x4xf32> to vector<288x4xf32>
    %c12 = arith.constant 12 : index
    %c0_17 = arith.constant 0 : index
    %26 = vector.load %arg4[%c12, %c0_17] : memref<36x128xf32, #tpu.memory_space<vmem>>, vector<4x128xf32>
    %cst_18 = arith.constant dense<0.000000e+00> : vector<288x128xf32>
    %27 = tpu.matmul %25, %26, %cst_18 {dimension_numbers = #tpu.dot_dimension_numbers<[1], [0], [0], [1], [0, 0, 1, 1], [], []>} : vector<288x4xf32>, vector<4x128xf32>, vector<288x128xf32> -> vector<288x128xf32>
    %28 = arith.addf %21, %27 : vector<288x128xf32>
    %c19_i32 = arith.constant 19 : i32
    %29 = arith.addi %1, %c19_i32 : i32
    %c0_19 = arith.constant 0 : index
    %c0_20 = arith.constant 0 : index
    %30 = arith.index_cast %29 : i32 to index
    %c0_21 = arith.constant 0 : index
    %31 = vector.load %arg3[%c0_19, %c0_20, %30, %c0_21] : memref<1x1x342x4xf32, #tpu.memory_space<vmem>>, vector<1x1x288x4xf32>
    %32 = vector.shape_cast %31 : vector<1x1x288x4xf32> to vector<288x4xf32>
    %c16 = arith.constant 16 : index
    %c0_22 = arith.constant 0 : index
    %33 = vector.load %arg4[%c16, %c0_22] : memref<36x128xf32, #tpu.memory_space<vmem>>, vector<4x128xf32>
    %cst_23 = arith.constant dense<0.000000e+00> : vector<288x128xf32>
    %34 = tpu.matmul %32, %33, %cst_23 {dimension_numbers = #tpu.dot_dimension_numbers<[1], [0], [0], [1], [0, 0, 1, 1], [], []>} : vector<288x4xf32>, vector<4x128xf32>, vector<288x128xf32> -> vector<288x128xf32>
    %35 = arith.addf %28, %34 : vector<288x128xf32>
    %c20_i32 = arith.constant 20 : i32
    %36 = arith.addi %1, %c20_i32 : i32
    %c0_24 = arith.constant 0 : index
    %c0_25 = arith.constant 0 : index
    %37 = arith.index_cast %36 : i32 to index
    %c0_26 = arith.constant 0 : index
    %38 = vector.load %arg3[%c0_24, %c0_25, %37, %c0_26] : memref<1x1x342x4xf32, #tpu.memory_space<vmem>>, vector<1x1x288x4xf32>
    %39 = vector.shape_cast %38 : vector<1x1x288x4xf32> to vector<288x4xf32>
    %c20 = arith.constant 20 : index
    %c0_27 = arith.constant 0 : index
    %40 = vector.load %arg4[%c20, %c0_27] : memref<36x128xf32, #tpu.memory_space<vmem>>, vector<4x128xf32>
    %cst_28 = arith.constant dense<0.000000e+00> : vector<288x128xf32>
    %41 = tpu.matmul %39, %40, %cst_28 {dimension_numbers = #tpu.dot_dimension_numbers<[1], [0], [0], [1], [0, 0, 1, 1], [], []>} : vector<288x4xf32>, vector<4x128xf32>, vector<288x128xf32> -> vector<288x128xf32>
    %42 = arith.addf %35, %41 : vector<288x128xf32>
    %c36_i32 = arith.constant 36 : i32
    %43 = arith.addi %1, %c36_i32 : i32
    %c0_29 = arith.constant 0 : index
    %c0_30 = arith.constant 0 : index
    %44 = arith.index_cast %43 : i32 to index
    %c0_31 = arith.constant 0 : index
    %45 = vector.load %arg3[%c0_29, %c0_30, %44, %c0_31] : memref<1x1x342x4xf32, #tpu.memory_space<vmem>>, vector<1x1x288x4xf32>
    %46 = vector.shape_cast %45 : vector<1x1x288x4xf32> to vector<288x4xf32>
    %c24 = arith.constant 24 : index
    %c0_32 = arith.constant 0 : index
    %47 = vector.load %arg4[%c24, %c0_32] : memref<36x128xf32, #tpu.memory_space<vmem>>, vector<4x128xf32>
    %cst_33 = arith.constant dense<0.000000e+00> : vector<288x128xf32>
    %48 = tpu.matmul %46, %47, %cst_33 {dimension_numbers = #tpu.dot_dimension_numbers<[1], [0], [0], [1], [0, 0, 1, 1], [], []>} : vector<288x4xf32>, vector<4x128xf32>, vector<288x128xf32> -> vector<288x128xf32>
    %49 = arith.addf %42, %48 : vector<288x128xf32>
    %c37_i32 = arith.constant 37 : i32
    %50 = arith.addi %1, %c37_i32 : i32
    %c0_34 = arith.constant 0 : index
    %c0_35 = arith.constant 0 : index
    %51 = arith.index_cast %50 : i32 to index
    %c0_36 = arith.constant 0 : index
    %52 = vector.load %arg3[%c0_34, %c0_35, %51, %c0_36] : memref<1x1x342x4xf32, #tpu.memory_space<vmem>>, vector<1x1x288x4xf32>
    %53 = vector.shape_cast %52 : vector<1x1x288x4xf32> to vector<288x4xf32>
    %c28 = arith.constant 28 : index
    %c0_37 = arith.constant 0 : index
    %54 = vector.load %arg4[%c28, %c0_37] : memref<36x128xf32, #tpu.memory_space<vmem>>, vector<4x128xf32>
    %cst_38 = arith.constant dense<0.000000e+00> : vector<288x128xf32>
    %55 = tpu.matmul %53, %54, %cst_38 {dimension_numbers = #tpu.dot_dimension_numbers<[1], [0], [0], [1], [0, 0, 1, 1], [], []>} : vector<288x4xf32>, vector<4x128xf32>, vector<288x128xf32> -> vector<288x128xf32>
    %56 = arith.addf %49, %55 : vector<288x128xf32>
    %c38_i32 = arith.constant 38 : i32
    %57 = arith.addi %1, %c38_i32 : i32
    %c0_39 = arith.constant 0 : index
    %c0_40 = arith.constant 0 : index
    %58 = arith.index_cast %57 : i32 to index
    %c0_41 = arith.constant 0 : index
    %59 = vector.load %arg3[%c0_39, %c0_40, %58, %c0_41] : memref<1x1x342x4xf32, #tpu.memory_space<vmem>>, vector<1x1x288x4xf32>
    %60 = vector.shape_cast %59 : vector<1x1x288x4xf32> to vector<288x4xf32>
    %c32 = arith.constant 32 : index
    %c0_42 = arith.constant 0 : index
    %61 = vector.load %arg4[%c32, %c0_42] : memref<36x128xf32, #tpu.memory_space<vmem>>, vector<4x128xf32>
    %cst_43 = arith.constant dense<0.000000e+00> : vector<288x128xf32>
    %62 = tpu.matmul %60, %61, %cst_43 {dimension_numbers = #tpu.dot_dimension_numbers<[1], [0], [0], [1], [0, 0, 1, 1], [], []>} : vector<288x4xf32>, vector<4x128xf32>, vector<288x128xf32> -> vector<288x128xf32>
    %63 = arith.addf %56, %62 : vector<288x128xf32>
    %c0_44 = arith.constant 0 : index
    %c0_45 = arith.constant 0 : index
    %64 = vector.load %arg5[%c0_44, %c0_45] : memref<1x128xf32, #tpu.memory_space<vmem>>, vector<1x128xf32>
    %65 = vector.broadcast %64 : vector<1x128xf32> to vector<288x128xf32>
    %66 = arith.addf %63, %65 : vector<288x128xf32>
    %cst_46 = arith.constant 5.000000e-01 : f32
    %67 = vector.broadcast %cst_46 : f32 to vector<288x128xf32>
    %68 = arith.mulf %67, %66 : vector<288x128xf32>
    %69 = math.tanh %68 : vector<288x128xf32>
    %cst_47 = arith.constant 1.000000e+00 : f32
    %70 = vector.broadcast %cst_47 : f32 to vector<288x128xf32>
    %71 = arith.addf %69, %70 : vector<288x128xf32>
    %cst_48 = arith.constant 5.000000e-01 : f32
    %72 = vector.broadcast %cst_48 : f32 to vector<288x128xf32>
    %73 = arith.mulf %72, %71 : vector<288x128xf32>
    %74 = arith.mulf %66, %73 : vector<288x128xf32>
    %c0_49 = arith.constant 0 : index
    %c0_50 = arith.constant 0 : index
    %c0_51 = arith.constant 0 : index
    %75 = vector.load %arg6[%c0_49, %c0_50, %c0_51] : memref<1x288x128xf32, #tpu.memory_space<vmem>>, vector<1x288x128xf32>
    %76 = vector.shape_cast %75 : vector<1x288x128xf32> to vector<288x128xf32>
    %77 = vector.shape_cast %74 : vector<288x128xf32> to vector<1x288x128xf32>
    tpu.vector_store %arg6[%c0_49, %c0_50, %c0_51], %77 {strides = array<i32>} : memref<1x288x128xf32, #tpu.memory_space<vmem>>, vector<1x288x128xf32>,
    return
  }
  func.func @transform_0(%arg0: i32, %arg1: i32, %arg2: i32) -> (i32, i32, i32, i32) {
    %c0_i32 = arith.constant 0 : i32
    %c0_i32_0 = arith.constant 0 : i32
    %c0_i32_1 = arith.constant 0 : i32
    %c0_i32_2 = arith.constant 0 : i32
    return %arg0, %c0_i32, %c0_i32_0, %c0_i32_1 : i32, i32, i32, i32
  }
  func.func @transform_1(%arg0: i32, %arg1: i32, %arg2: i32) -> (i32, i32) {
    %c0_i32 = arith.constant 0 : i32
    %c0_i32_0 = arith.constant 0 : i32
    return %c0_i32, %arg1 : i32, i32
  }
  func.func @transform_2(%arg0: i32, %arg1: i32, %arg2: i32) -> (i32, i32) {
    %c0_i32 = arith.constant 0 : i32
    %c0_i32_0 = arith.constant 0 : i32
    return %c0_i32, %arg1 : i32, i32
  }
  func.func @transform_3(%arg0: i32, %arg1: i32, %arg2: i32) -> (i32, i32, i32) {
    %c0_i32 = arith.constant 0 : i32
    return %arg0, %arg2, %arg1 : i32, i32, i32
  }
}

</mosaic_0001>

<bundles_post_ra>
// kernel: tpu_custom_call.1
= control target key start
LH: loop header
LB: loop body
LE: loop exit
PB: predicated region body
PF: predicated region fallthrough
CT: control target
= control target key end

     0   :  { %8 = vsyncpa [#allocation3], 0  ;;  %s7702_s0 = inlined_call_operand.vmem [shape: f32[2,1,342,4], index: 0, kind: input, shape index: {}]   ;;  %s7703_s1 = inlined_call_operand.vmem [shape: f32[36,128], index: 1, kind: input, shape index: {}]   ;;  %s7704_s2 = inlined_call_operand.vmem [shape: f32[1,128], index: 2, kind: input, shape index: {}]   ;;  %s7705_s3 = inlined_call_operand.hbm [shape: f32[2,288,128], index: 3, kind: output, shape index: {}]  }
   0x1   :  { %10 = vsyncpa [#allocation3 + $0x1], 0  ;;  %s6144_s12 = smov 0   ;;  %s6146_s13 = smov 0  }
   0x2   :  { %s6148_s14 = smov 0   ;;  %s6150_s15 = smov 0  }
   0x3   :  { %s6152_s16 = smov 0   ;;  %s6154_s17 = smov 0  }
   0x4 LB: > { %s4439_s18 = sadd.s32 4294967295, %s6119_s17   ;;  %s4440_s19 = sadd.s32 4294967294, %s6119_s17   ;;  %s6119_s17 = sphi %s6154_s17, %s16_s17   ;;  %s6115_s16 = sphi %s6152_s16, %s7712_s16   ;;  %s6111_s15 = sphi %s6150_s15, %s7711_s15   ;;  %s6107_s14 = sphi %s6148_s14, %s7710_s14   ;;  %s6103_s13 = sphi %s6146_s13, %s7709_s13   ;;  %s6099_s12 = sphi %s6144_s12, %s7708_s12  }
   0x5   : > { %s35_s20 = sadd.s32 1, %s6115_s16  ;;  %s124_s21 = sadd.s32 1, %s6107_s14 }
   0x6   : > { %p37_p0 = scmp.ge.s32.totalorder %s35_s20, 2  ;;  %p134_p1 = scmp.ne.s32.totalorder %s6107_s14, %s6103_s13 }
   0x7   : > { %p135_p2 = scmp.eq.s32.totalorder %s4439_s18, 1  ;;  %p140_p3 = scmp.ne.s32.totalorder %s6103_s13, %s6099_s12 }
   0x8   : > { %s7714_s20 = smov (%p37_p0, %s35_s20), 0  ;;  %p141_p5 = scmp.eq.s32.totalorder %s4440_s19, 1 }
   0x9   : > { %p6184_p4 = por %p135_p2, %p134_p1  ;;  %s117_s23 = ssub.s32 %s6115_s16, %s7714_s20 }
   0xa   : > { %p4445_p6 = scmp.ge.s32.totalorder %s6119_s17, 1  ;;  %p122_p7 = scmp.eq.s32.totalorder %s117_s23, 0 }
   0xb   : > { %p6191_p8 = por %p141_p5, %p140_p3  ;;  %p180_p9 = scmp.lt.s32.totalorder %s6119_s17, 3 }
   0xc   : > { %s6197_s25 = scalar_select %p122_p7, %s6107_s14, %s124_s21  }
   0xd   : > { %p181_p10 = pnand %p4445_p6, %p180_p9 }
   0xe   : > { %p211_p11 = scmp.lt.s32.totalorder (!%p181_p10), %s6111_s15, 1  ;;  %s208_s7 = sand.u32 (!%p181_p10), 1, %s6103_s13  }
   0xf   : > { %184 = sbr.rel (%p181_p10) target bundleno = 587 (0x24b), region = 32  ;;  %s6121_s26 = smov (!%p181_p10), [#allocation2]  }
  0x10   : > { %s7443_s8 = smul.u32 (!%p181_p10), 288, %s208_s7  ;;  %s6047_s27 = sshll.u32 (!%p181_p10), %s6121_s26, 4  ;;  %s6048_s27 = int_to_ptr.vmem [resolvable:$false] %s6047_s27 }
  0x11   : > { %s5913_s10 = smul.u32 (!%p181_p10), 4608, %s6111_s15  ;;  %s6049_s28 = scalar_lea.vmem (!%p181_p10), %s6048_s27, 9216 }
  0x13   : > { %s7650_s21 = scalar_lea.hbm (!%p181_p10), %s7705_s3, %s5913_s10 }
  0x14   : > { %v301_v0 = vld [vmem:[%s7703_s1 + $0x4] sm:$0xf]  ;;  %vm411_vm0 = vcmask 1043456   ;;  %v262_v1 = vld [vmem:[%s7703_s1] sm:$0xf]  ;;  %s212_s5 = scalar_select %p211_p11, %s6111_s15, 1 }
  0x15   : > { %5909 = vmatprep.subr.msk.mxu1 %vm411_vm0, %v301_v0  ;;  %5405 = vmatprep.subr.msk.mxu0 %vm411_vm0, %v301_v0  ;;  %v1054_v2 = vld [vmem:[%s7703_s1 + $0x8] sm:$0xf]  ;;  %vm302_vm1 = vcmask 31744   ;;  %v6234_v9 = vld [vmem:[%s7703_s1 + $0xc] sm:$0xf]  ;;  %s7657_s15 = scalar_lea.sflag [#allocation3], %s208_s7 }
  0x16   : > { %5910 = vmatpush3.msk.msra.mxu1 %vm411_vm0, %v301_v0  ;;  %5406 = vmatpush3.msk.msra.mxu0 %vm411_vm0, %v301_v0  ;;  %s5912_s6 = smul.u32 344, %s212_s5  ;;  %v6239_v10 = vld [vmem:[%s7703_s1 + $0x10] sm:$0xf]  ;;  %v6324_v47 = vld [vmem:[%s7703_s1 + $0x14] sm:$0xf] }
  0x17   : > { %5461 = vmatprep.subr.msk.mxu1 %vm411_vm0, %v262_v1  ;;  %5517 = vmatprep.subr.msk.mxu0 %vm411_vm0, %v1054_v2  ;;  %v6329_v48 = vld [vmem:[%s7703_s1 + $0x18] sm:$0xf] }
  0x18   : > { %s6219_s9 = scalar_lea.vmem %s7702_s0, %s5912_s6 }
  0x19   : > { %v4447_v3 = vld [vmem:[%s6219_s9 + $0x1] sm:$0xff]  ;;  %v4465_v4 = vld [vmem:[%s6219_s9 + $0x91] sm:$0xff]  ;;  %v4448_v5 = vld [vmem:[%s6219_s9 + $0x9] sm:$0xff] }
  0x1a   : > { %5407 = vmatprep.mubr.msk.f32.mxu0 %vm302_vm1, %v4447_v3  ;;  %5434 = vmatprep.mubr.msk.f32.mxu1 %vm302_vm1, %v4465_v4  ;;  %v4466_v6 = vld [vmem:[%s6219_s9 + $0x99] sm:$0xff]  ;;  %v4449_v7 = vld [vmem:[%s6219_s9 + $0x11] sm:$0xff]  ;;  %v4467_v8 = vld [vmem:[%s6219_s9 + $0xa1] sm:$0xff] }
  0x1b   : > { %5408 = vmatmul.mubr.msk.f32.vlgmr.msra.gmra.mxu0 %vm302_vm1, %v4448_v5  ;;  %5435 = vmatmul.mubr.msk.f32.vlgmr.msra.gmra.mxu1 %vm302_vm1, %v4466_v6  ;;  %v4450_v11 = vld [vmem:[%s6219_s9 + $0x19] sm:$0xff]  ;;  %v4468_v12 = vld [vmem:[%s6219_s9 + $0xa9] sm:$0xff]  ;;  %v4451_v13 = vld [vmem:[%s6219_s9 + $0x21] sm:$0xff] }
  0x1c   : > { %5462 = vmatpush3.msk.msra.mxu1 %vm411_vm0, %v262_v1  ;;  %5518 = vmatpush3.msk.msra.mxu0 %vm411_vm0, %v1054_v2  ;;  %v4469_v14 = vld [vmem:[%s6219_s9 + $0xb1] sm:$0xff]  ;;  %v4452_v15 = vld [vmem:[%s6219_s9 + $0x29] sm:$0xff]  ;;  %v4470_v16 = vld [vmem:[%s6219_s9 + $0xb9] sm:$0xff] }
  0x1d   : > { %5410 = vmatprep.mubr.msk.f32.mxu0 %vm302_vm1, %v4449_v7  ;;  %5437 = vmatprep.mubr.msk.f32.mxu1 %vm302_vm1, %v4467_v8  ;;  %v4453_v17 = vld [vmem:[%s6219_s9 + $0x31] sm:$0xff]  ;;  %v4471_v18 = vld [vmem:[%s6219_s9 + $0xc1] sm:$0xff]  ;;  %v4454_v19 = vld [vmem:[%s6219_s9 + $0x39] sm:$0xff] }
  0x1e   : > { %5573 = vmatprep.subr.msk.mxu1 %vm411_vm0, %v6234_v9  ;;  %5629 = vmatprep.subr.msk.mxu0 %vm411_vm0, %v6239_v10  ;;  %v4472_v20 = vld [vmem:[%s6219_s9 + $0xc9] sm:$0xff]  ;;  %v4455_v21 = vld [vmem:[%s6219_s9 + $0x41] sm:$0xff]  ;;  %v4473_v22 = vld [vmem:[%s6219_s9 + $0xd1] sm:$0xff] }
  0x1f   : > { %5411 = vmatmul.mubr.msk.f32.gmra.mxu0 %vm302_vm1, %v4450_v11  ;;  %5438 = vmatmul.mubr.msk.f32.gmra.mxu1 %vm302_vm1, %v4468_v12  ;;  %v4456_v23 = vld [vmem:[%s6219_s9 + $0x49] sm:$0xff]  ;;  %v4474_v24 = vld [vmem:[%s6219_s9 + $0xd9] sm:$0xff]  ;;  %v4457_v25 = vld [vmem:[%s6219_s9 + $0x51] sm:$0xff] }
  0x20   : > { %5413 = vmatprep.mubr.msk.f32.mxu0 %vm302_vm1, %v4451_v13  ;;  %5440 = vmatprep.mubr.msk.f32.mxu1 %vm302_vm1, %v4469_v14  ;;  %v4475_v26 = vld [vmem:[%s6219_s9 + $0xe1] sm:$0xff]  ;;  %v4458_v27 = vld [vmem:[%s6219_s9 + $0x59] sm:$0xff]  ;;  %v4476_v28 = vld [vmem:[%s6219_s9 + $0xe9] sm:$0xff] }
  0x21   : > { %v4459_v29 = vld [vmem:[%s6219_s9 + $0x61] sm:$0xff]  ;;  %v4477_v30 = vld [vmem:[%s6219_s9 + $0xf1] sm:$0xff]  ;;  %v4460_v31 = vld [vmem:[%s6219_s9 + $0x69] sm:$0xff] }
  0x22   : > { %v4478_v32 = vld [vmem:[%s6219_s9 + $0xf9] sm:$0xff]  ;;  %v4461_v33 = vld [vmem:[%s6219_s9 + $0x71] sm:$0xff]  ;;  %v4479_v34 = vld [vmem:[%s6219_s9 + $0x101] sm:$0xff] }
  0x23   : > { %5414 = vmatmul.mubr.msk.f32.gmra.mxu0 %vm302_vm1, %v4452_v15  ;;  %5441 = vmatmul.mubr.msk.f32.gmra.mxu1 %vm302_vm1, %v4470_v16  ;;  %v4462_v35 = vld [vmem:[%s6219_s9 + $0x79] sm:$0xff]  ;;  %v4480_v36 = vld [vmem:[%s6219_s9 + $0x109] sm:$0xff]  ;;  %v4463_v37 = vld [vmem:[%s6219_s9 + $0x81] sm:$0xff] }
  0x24   : > { %5416 = vmatprep.mubr.msk.f32.mxu0 %vm302_vm1, %v4453_v17  ;;  %5443 = vmatprep.mubr.msk.f32.mxu1 %vm302_vm1, %v4471_v18  ;;  %v4481_v38 = vld [vmem:[%s6219_s9 + $0x111] sm:$0xff]  ;;  %v4464_v39 = vld [vmem:[%s6219_s9 + $0x89] sm:$0xff]  ;;  %v4482_v40 = vld [vmem:[%s6219_s9 + $0x119] sm:$0xff] }
  0x25   : > { %v226_v41 = vld [vmem:[%s6219_s9] sm:$0xff]  ;;  %v227_v43 = vld [vmem:[%s6219_s9 + $0x8] sm:$0xff]  ;;  %v228_v45 = vld [vmem:[%s6219_s9 + $0x10] sm:$0xff] }
  0x26   : > { %v4557_v42 = vld [vmem:[%s6219_s9 + $0x2] sm:$0xff]  ;;  %v4558_v44 = vld [vmem:[%s6219_s9 + $0xa] sm:$0xff]  ;;  %v6317_v46 = vld [vmem:[%s6219_s9 + $0x12] sm:$0xff] }
  0x27   : > { %5417 = vmatmul.mubr.msk.f32.gmra.mxu0 %vm302_vm1, %v4454_v19  ;;  %5444 = vmatmul.mubr.msk.f32.gmra.mxu1 %vm302_vm1, %v4472_v20  ;;  %v229_v49 = vld [vmem:[%s6219_s9 + $0x18] sm:$0xff]  ;;  %v230_v51 = vld [vmem:[%s6219_s9 + $0x20] sm:$0xff]  ;;  %v231_v53 = vld [vmem:[%s6219_s9 + $0x28] sm:$0xff] }
  0x28   : > { %5419 = vmatprep.mubr.msk.f32.mxu0 %vm302_vm1, %v4455_v21  ;;  %5446 = vmatprep.mubr.msk.f32.mxu1 %vm302_vm1, %v4473_v22  ;;  %v6337_v50 = vld [vmem:[%s6219_s9 + $0x1a] sm:$0xff]  ;;  %v6344_v52 = vld [vmem:[%s6219_s9 + $0x22] sm:$0xff]  ;;  %v6358_v54 = vld [vmem:[%s6219_s9 + $0x2a] sm:$0xff] }
  0x29   : > { %v232_v55 = vld [vmem:[%s6219_s9 + $0x30] sm:$0xff]  ;;  %v233_v57 = vld [vmem:[%s6219_s9 + $0x38] sm:$0xff]  ;;  %v234_v59 = vld [vmem:[%s6219_s9 + $0x40] sm:$0xff] }
  0x2a   : > { %v6362_v56 = vld [vmem:[%s6219_s9 + $0x32] sm:$0xff]  ;;  %v6372_v58 = vld [vmem:[%s6219_s9 + $0x3a] sm:$0xff]  ;;  %v6376_v60 = vld [vmem:[%s6219_s9 + $0x42] sm:$0xff] }
  0x2b   : > { %5420 = vmatmul.mubr.msk.f32.gmra.mxu0 %vm302_vm1, %v4456_v23  ;;  %5447 = vmatmul.mubr.msk.f32.gmra.mxu1 %vm302_vm1, %v4474_v24  ;;  %v235_v61 = vld [vmem:[%s6219_s9 + $0x48] sm:$0xff]  ;;  %v236_v63 = vld [vmem:[%s6219_s9 + $0x50] sm:$0xff]  ;;  %v237_v1 = vld [vmem:[%s6219_s9 + $0x58] sm:$0xff] }
  0x2c   : > { %5422 = vmatprep.mubr.msk.f32.mxu0 %vm302_vm1, %v4457_v25  ;;  %5449 = vmatprep.mubr.msk.f32.mxu1 %vm302_vm1, %v4475_v26  ;;  %v6386_v62 = vld [vmem:[%s6219_s9 + $0x4a] sm:$0xff]  ;;  %v6390_v0 = vld [vmem:[%s6219_s9 + $0x52] sm:$0xff]  ;;  %v6400_v2 = vld [vmem:[%s6219_s9 + $0x5a] sm:$0xff] }
  0x2d   : > { %v238_v3 = vld [vmem:[%s6219_s9 + $0x60] sm:$0xff]  ;;  %v239_v5 = vld [vmem:[%s6219_s9 + $0x68] sm:$0xff]  ;;  %v240_v7 = vld [vmem:[%s6219_s9 + $0x70] sm:$0xff] }
  0x2e   : > { %v6404_v4 = vld [vmem:[%s6219_s9 + $0x62] sm:$0xff]  ;;  %v6414_v6 = vld [vmem:[%s6219_s9 + $0x6a] sm:$0xff]  ;;  %v6418_v8 = vld [vmem:[%s6219_s9 + $0x72] sm:$0xff] }
  0x2f   : > { %5423 = vmatmul.mubr.msk.f32.gmra.mxu0 %vm302_vm1, %v4458_v27  ;;  %5450 = vmatmul.mubr.msk.f32.gmra.mxu1 %vm302_vm1, %v4476_v28  ;;  %v242_v11 = vld [vmem:[%s6219_s9 + $0x80] sm:$0xff]  ;;  %v243_v13 = vld [vmem:[%s6219_s9 + $0x88] sm:$0xff]  ;;  %v244_v15 = vld [vmem:[%s6219_s9 + $0x90] sm:$0xff] }
  0x30   : > { %5425 = vmatprep.mubr.msk.f32.mxu0 %vm302_vm1, %v4459_v29  ;;  %5452 = vmatprep.mubr.msk.f32.mxu1 %vm302_vm1, %v4477_v30  ;;  %v6432_v12 = vld [vmem:[%s6219_s9 + $0x82] sm:$0xff]  ;;  %v6442_v14 = vld [vmem:[%s6219_s9 + $0x8a] sm:$0xff]  ;;  %v6446_v16 = vld [vmem:[%s6219_s9 + $0x92] sm:$0xff] }
  0x31   : > { %v245_v17 = vld [vmem:[%s6219_s9 + $0x98] sm:$0xff]  ;;  %v246_v19 = vld [vmem:[%s6219_s9 + $0xa0] sm:$0xff]  ;;  %v247_v21 = vld [vmem:[%s6219_s9 + $0xa8] sm:$0xff] }
  0x32   : > { %v6456_v18 = vld [vmem:[%s6219_s9 + $0x9a] sm:$0xff]  ;;  %v6460_v20 = vld [vmem:[%s6219_s9 + $0xa2] sm:$0xff]  ;;  %v6470_v22 = vld [vmem:[%s6219_s9 + $0xaa] sm:$0xff] }
  0x33   : > { %5426 = vmatmul.mubr.msk.f32.gmra.mxu0 %vm302_vm1, %v4460_v31  ;;  %5453 = vmatmul.mubr.msk.f32.gmra.mxu1 %vm302_vm1, %v4478_v32  ;;  %v248_v23 = vld [vmem:[%s6219_s9 + $0xb0] sm:$0xff]  ;;  %v249_v25 = vld [vmem:[%s6219_s9 + $0xb8] sm:$0xff]  ;;  %v250_v27 = vld [vmem:[%s6219_s9 + $0xc0] sm:$0xff] }
  0x34   : > { %5428 = vmatprep.mubr.msk.f32.mxu0 %vm302_vm1, %v4461_v33  ;;  %5455 = vmatprep.mubr.msk.f32.mxu1 %vm302_vm1, %v4479_v34  ;;  %v6474_v24 = vld [vmem:[%s6219_s9 + $0xb2] sm:$0xff]  ;;  %v6484_v26 = vld [vmem:[%s6219_s9 + $0xba] sm:$0xff]  ;;  %v6488_v28 = vld [vmem:[%s6219_s9 + $0xc2] sm:$0xff] }
  0x35   : > { %v251_v29 = vld [vmem:[%s6219_s9 + $0xc8] sm:$0xff]  ;;  %v252_v31 = vld [vmem:[%s6219_s9 + $0xd0] sm:$0xff]  ;;  %v253_v33 = vld [vmem:[%s6219_s9 + $0xd8] sm:$0xff] }
  0x36   : > { %v6498_v30 = vld [vmem:[%s6219_s9 + $0xca] sm:$0xff]  ;;  %v6502_v32 = vld [vmem:[%s6219_s9 + $0xd2] sm:$0xff]  ;;  %v6512_v34 = vld [vmem:[%s6219_s9 + $0xda] sm:$0xff] }
  0x37   : > { %5429 = vmatmul.mubr.msk.f32.gmra.mxu0 %vm302_vm1, %v4462_v35  ;;  %5456 = vmatmul.mubr.msk.f32.gmra.mxu1 %vm302_vm1, %v4480_v36  ;;  %v254_v35 = vld [vmem:[%s6219_s9 + $0xe0] sm:$0xff] }
  0x38   : > { %5431 = vmatprep.mubr.msk.f32.mxu0 %vm302_vm1, %v4463_v37  ;;  %5458 = vmatprep.mubr.msk.f32.mxu1 %vm302_vm1, %v4481_v38  ;;  %v6516_v36 = vld [vmem:[%s6219_s9 + $0xe2] sm:$0xff]  ;;  %v6526_v38 = vld [vmem:[%s6219_s9 + $0xea] sm:$0xff] }
  0x39   : > { %v255_v37 = vld [vmem:[%s6219_s9 + $0xe8] sm:$0xff] }
  0x3b   : > { %5432 = vmatmul.mubr.msk.f32.gmra.mxu0 %vm302_vm1, %v4464_v39  ;;  %5459 = vmatmul.mubr.msk.f32.gmra.mxu1 %vm302_vm1, %v4482_v40  ;;  %v256_v39 = vld [vmem:[%s6219_s9 + $0xf0] sm:$0xff] }
  0x3c   : > { %5463 = vmatprep.mubr.msk.f32.mxu1 %vm302_vm1, %v226_v41  ;;  %5519 = vmatprep.mubr.msk.f32.mxu0 %vm302_vm1, %v4557_v42  ;;  %v6530_v40 = vld [vmem:[%s6219_s9 + $0xf2] sm:$0xff]  ;;  %v6540_v42 = vld [vmem:[%s6219_s9 + $0xfa] sm:$0xff] }
  0x3d   : > { %v257_v41 = vld [vmem:[%s6219_s9 + $0xf8] sm:$0xff] }
  0x3f   : > { %5464 = vmatmul.mubr.msk.f32.vlgmr.msra.gmra.mxu1 %vm302_vm1, %v227_v43  ;;  %5520 = vmatmul.mubr.msk.f32.vlgmr.msra.gmra.mxu0 %vm302_vm1, %v4558_v44  ;;  %v258_v43 = vld [vmem:[%s6219_s9 + $0x100] sm:$0xff] }
  0x40   : > { %5574 = vmatpush3.msk.msra.mxu1 %vm411_vm0, %v6234_v9  ;;  %5630 = vmatpush3.msk.msra.mxu0 %vm411_vm0, %v6239_v10  ;;  %v241_v9 = vld [vmem:[%s6219_s9 + $0x78] sm:$0xff]  ;;  %v6544_v44 = vld [vmem:[%s6219_s9 + $0x102] sm:$0xff] }
  0x41   : > { %5466 = vmatprep.mubr.msk.f32.mxu1 %vm302_vm1, %v228_v45  ;;  %5522 = vmatprep.mubr.msk.f32.mxu0 %vm302_vm1, %v6317_v46  ;;  %v6428_v10 = vld [vmem:[%s6219_s9 + $0x7a] sm:$0xff]  ;;  %v259_v45 = vld [vmem:[%s6219_s9 + $0x108] sm:$0xff] }
  0x42   : > { %5685 = vmatprep.subr.msk.mxu1 %vm411_vm0, %v6324_v47  ;;  %5741 = vmatprep.subr.msk.mxu0 %vm411_vm0, %v6329_v48 }
  0x43   : > { %5467 = vmatmul.mubr.msk.f32.gmra.mxu1 %vm302_vm1, %v229_v49  ;;  %5523 = vmatmul.mubr.msk.f32.gmra.mxu0 %vm302_vm1, %v6337_v50  ;;  %v6554_v49 = vld [vmem:[%s6219_s9 + $0x10a] sm:$0xff] }
  0x44   : > { %5469 = vmatprep.mubr.msk.f32.mxu1 %vm302_vm1, %v230_v51  ;;  %5525 = vmatprep.mubr.msk.f32.mxu0 %vm302_vm1, %v6344_v52  ;;  %v260_v51 = vld [vmem:[%s6219_s9 + $0x110] sm:$0xff] }
  0x47   : > { %5470 = vmatmul.mubr.msk.f32.gmra.mxu1 %vm302_vm1, %v231_v53  ;;  %5526 = vmatmul.mubr.msk.f32.gmra.mxu0 %vm302_vm1, %v6358_v54  ;;  %v6558_v53 = vld [vmem:[%s6219_s9 + $0x112] sm:$0xff] }
  0x48   : > { %5472 = vmatprep.mubr.msk.f32.mxu1 %vm302_vm1, %v232_v55  ;;  %5528 = vmatprep.mubr.msk.f32.mxu0 %vm302_vm1, %v6362_v56  ;;  %v261_v55 = vld [vmem:[%s6219_s9 + $0x118] sm:$0xff] }
  0x4b   : > { %5473 = vmatmul.mubr.msk.f32.gmra.mxu1 %vm302_vm1, %v233_v57  ;;  %5529 = vmatmul.mubr.msk.f32.gmra.mxu0 %vm302_vm1, %v6372_v58  ;;  %v6568_v57 = vld [vmem:[%s6219_s9 + $0x11a] sm:$0xff] }
  0x4c   : > { %5475 = vmatprep.mubr.msk.f32.mxu1 %vm302_vm1, %v234_v59  ;;  %5531 = vmatprep.mubr.msk.f32.mxu0 %vm302_vm1, %v6376_v60  ;;  %v4703_v59 = vld [vmem:[%s6219_s9 + $0x13] sm:$0xff] }
  0x4f   : > { %5476 = vmatmul.mubr.msk.f32.gmra.mxu1 %vm302_vm1, %v235_v61  ;;  %5532 = vmatmul.mubr.msk.f32.gmra.mxu0 %vm302_vm1, %v6386_v62  ;;  %v4704_v61 = vld [vmem:[%s6219_s9 + $0x1b] sm:$0xff] }
  0x50   : > { %5478 = vmatprep.mubr.msk.f32.mxu1 %vm302_vm1, %v236_v63  ;;  %5534 = vmatprep.mubr.msk.f32.mxu0 %vm302_vm1, %v6390_v0  ;;  %v4705_v63 = vld [vmem:[%s6219_s9 + $0x23] sm:$0xff] }
  0x53   : > { %5479 = vmatmul.mubr.msk.f32.gmra.mxu1 %vm302_vm1, %v237_v1  ;;  %5535 = vmatmul.mubr.msk.f32.gmra.mxu0 %vm302_vm1, %v6400_v2  ;;  %v6585_v1 = vld [vmem:[%s7703_s1 + $0x1c] sm:$0xf] }
  0x54   : > { %5481 = vmatprep.mubr.msk.f32.mxu1 %vm302_vm1, %v238_v3  ;;  %5537 = vmatprep.mubr.msk.f32.mxu0 %vm302_vm1, %v6404_v4  ;;  %v4707_v3 = vld [vmem:[%s6219_s9 + $0x33] sm:$0xff] }
  0x57   : > { %5482 = vmatmul.mubr.msk.f32.gmra.mxu1 %vm302_vm1, %v239_v5  ;;  %5538 = vmatmul.mubr.msk.f32.gmra.mxu0 %vm302_vm1, %v6414_v6  ;;  %v4719_v5 = vld [vmem:[%s6219_s9 + $0x93] sm:$0xff] }
  0x58   : > { %5484 = vmatprep.mubr.msk.f32.mxu1 %vm302_vm1, %v240_v7  ;;  %5540 = vmatprep.mubr.msk.f32.mxu0 %vm302_vm1, %v6418_v8  ;;  %v4721_v7 = vld [vmem:[%s6219_s9 + $0xa3] sm:$0xff] }
  0x5b   : > { %5485 = vmatmul.mubr.msk.f32.gmra.mxu1 %vm302_vm1, %v241_v9  ;;  %5541 = vmatmul.mubr.msk.f32.gmra.mxu0 %vm302_vm1, %v6428_v10  ;;  %v4723_v9 = vld [vmem:[%s6219_s9 + $0xb3] sm:$0xff] }
  0x5c   : > { %5487 = vmatprep.mubr.msk.f32.mxu1 %vm302_vm1, %v242_v11  ;;  %5543 = vmatprep.mubr.msk.f32.mxu0 %vm302_vm1, %v6432_v12  ;;  %v4725_v11 = vld [vmem:[%s6219_s9 + $0xc3] sm:$0xff] }
  0x5f   : > { %5488 = vmatmul.mubr.msk.f32.gmra.mxu1 %vm302_vm1, %v243_v13  ;;  %5544 = vmatmul.mubr.msk.f32.gmra.mxu0 %vm302_vm1, %v6442_v14  ;;  %v4727_v13 = vld [vmem:[%s6219_s9 + $0xd3] sm:$0xff] }
  0x60   : > { %5490 = vmatprep.mubr.msk.f32.mxu1 %vm302_vm1, %v244_v15  ;;  %5546 = vmatprep.mubr.msk.f32.mxu0 %vm302_vm1, %v6446_v16  ;;  %v4729_v15 = vld [vmem:[%s6219_s9 + $0xe3] sm:$0xff] }
  0x63   : > { %5491 = vmatmul.mubr.msk.f32.gmra.mxu1 %vm302_vm1, %v245_v17  ;;  %5547 = vmatmul.mubr.msk.f32.gmra.mxu0 %vm302_vm1, %v6456_v18  ;;  %v4731_v17 = vld [vmem:[%s6219_s9 + $0xf3] sm:$0xff] }
  0x64   : > { %5493 = vmatprep.mubr.msk.f32.mxu1 %vm302_vm1, %v246_v19  ;;  %5549 = vmatprep.mubr.msk.f32.mxu0 %vm302_vm1, %v6460_v20  ;;  %v4733_v19 = vld [vmem:[%s6219_s9 + $0x103] sm:$0xff] }
  0x67   : > { %5494 = vmatmul.mubr.msk.f32.gmra.mxu1 %vm302_vm1, %v247_v21  ;;  %5550 = vmatmul.mubr.msk.f32.gmra.mxu0 %vm302_vm1, %v6470_v22  ;;  %v4735_v21 = vld [vmem:[%s6219_s9 + $0x113] sm:$0xff] }
  0x68   : > { %5496 = vmatprep.mubr.msk.f32.mxu1 %vm302_vm1, %v248_v23  ;;  %5552 = vmatprep.mubr.msk.f32.mxu0 %vm302_vm1, %v6474_v24  ;;  %v4664_v23 = vld [vmem:[%s6219_s9 + $0x122] sm:$0xff] }
  0x6b   : > { %5497 = vmatmul.mubr.msk.f32.gmra.mxu1 %vm302_vm1, %v249_v25  ;;  %5553 = vmatmul.mubr.msk.f32.gmra.mxu0 %vm302_vm1, %v6484_v26  ;;  %v4665_v25 = vld [vmem:[%s6219_s9 + $0x12a] sm:$0xff] }
  0x6c   : > { %5499 = vmatprep.mubr.msk.f32.mxu1 %vm302_vm1, %v250_v27  ;;  %5555 = vmatprep.mubr.msk.f32.mxu0 %vm302_vm1, %v6488_v28  ;;  %v4776_v27 = vld [vmem:[%s6219_s9 + $0x14] sm:$0xff] }
  0x6f   : > { %5500 = vmatmul.mubr.msk.f32.gmra.mxu1 %vm302_vm1, %v251_v29  ;;  %5556 = vmatmul.mubr.msk.f32.gmra.mxu0 %vm302_vm1, %v6498_v30  ;;  %v4777_v29 = vld [vmem:[%s6219_s9 + $0x1c] sm:$0xff] }
  0x70   : > { %5502 = vmatprep.mubr.msk.f32.mxu1 %vm302_vm1, %v252_v31  ;;  %5558 = vmatprep.mubr.msk.f32.mxu0 %vm302_vm1, %v6502_v32  ;;  %v4851_v31 = vld [vmem:[%s6219_s9 + $0x34] sm:$0xff] }
  0x73   : > { %5503 = vmatmul.mubr.msk.f32.gmra.mxu1 %vm302_vm1, %v253_v33  ;;  %5559 = vmatmul.mubr.msk.f32.gmra.mxu0 %vm302_vm1, %v6512_v34  ;;  %v4853_v33 = vld [vmem:[%s6219_s9 + $0x44] sm:$0xff] }
  0x74   : > { %5505 = vmatprep.mubr.msk.f32.mxu1 %vm302_vm1, %v254_v35  ;;  %5561 = vmatprep.mubr.msk.f32.mxu0 %vm302_vm1, %v6516_v36  ;;  %v4855_v35 = vld [vmem:[%s6219_s9 + $0x54] sm:$0xff] }
  0x77   : > { %5506 = vmatmul.mubr.msk.f32.gmra.mxu1 %vm302_vm1, %v255_v37  ;;  %5562 = vmatmul.mubr.msk.f32.gmra.mxu0 %vm302_vm1, %v6526_v38  ;;  %v4857_v37 = vld [vmem:[%s6219_s9 + $0x64] sm:$0xff] }
  0x78   : > { %5508 = vmatprep.mubr.msk.f32.mxu1 %vm302_vm1, %v256_v39  ;;  %5564 = vmatprep.mubr.msk.f32.mxu0 %vm302_vm1, %v6530_v40 }
  0x7b   : > { %5509 = vmatmul.mubr.msk.f32.gmra.mxu1 %vm302_vm1, %v257_v41  ;;  %5565 = vmatmul.mubr.msk.f32.gmra.mxu0 %vm302_vm1, %v6540_v42 }
  0x7c   : > { %5511 = vmatprep.mubr.msk.f32.mxu1 %vm302_vm1, %v258_v43  ;;  %5567 = vmatprep.mubr.msk.f32.mxu0 %vm302_vm1, %v6544_v44  ;;  %v4859_v43 = vld [vmem:[%s6219_s9 + $0x74] sm:$0xff] }
  0x7f   : > { %5512 = vmatmul.mubr.msk.f32.gmra.mxu1 %vm302_vm1, %v259_v45  ;;  %5568 = vmatmul.mubr.msk.f32.gmra.mxu0 %vm302_vm1, %v6554_v49 }
  0x80   : > { %5514 = vmatprep.mubr.msk.f32.mxu1 %vm302_vm1, %v260_v51  ;;  %5570 = vmatprep.mubr.msk.f32.mxu0 %vm302_vm1, %v6558_v53 }
  0x83   : > { %5515 = vmatmul.mubr.msk.f32.gmra.mxu1 %vm302_vm1, %v261_v55  ;;  %5571 = vmatmul.mubr.msk.f32.gmra.mxu0 %vm302_vm1, %v6568_v57  ;;  %v4861_v55 = vld [vmem:[%s6219_s9 + $0x84] sm:$0xff] }
  0x84   : > { %5575 = vmatprep.mubr.msk.f32.mxu1 %vm302_vm1, %v6317_v46  ;;  %5631 = vmatprep.mubr.msk.f32.mxu0 %vm302_vm1, %v4703_v59  ;;  %v6590_v46 = vld [vmem:[%s7703_s1 + $0x20] sm:$0xf] }
  0x87   : > { %5576 = vmatmul.mubr.msk.f32.vlgmr.msra.gmra.mxu1 %vm302_vm1, %v6337_v50  ;;  %5632 = vmatmul.mubr.msk.f32.vlgmr.msra.gmra.mxu0 %vm302_vm1, %v4704_v61  ;;  %v4706_v50 = vld [vmem:[%s6219_s9 + $0x2b] sm:$0xff] }
  0x88   : > { %5686 = vmatpush3.msk.msra.mxu1 %vm411_vm0, %v6324_v47  ;;  %5742 = vmatpush3.msk.msra.mxu0 %vm411_vm0, %v6329_v48  ;;  %v4708_v47 = vld [vmem:[%s6219_s9 + $0x3b] sm:$0xff]  ;;  %v4709_v48 = vld [vmem:[%s6219_s9 + $0x43] sm:$0xff]  ;;  %v4862_v61 = vld [vmem:[%s6219_s9 + $0x8c] sm:$0xff] }
  0x89   : > { %5578 = vmatprep.mubr.msk.f32.mxu1 %vm302_vm1, %v6344_v52  ;;  %5634 = vmatprep.mubr.msk.f32.mxu0 %vm302_vm1, %v4705_v63  ;;  %v4710_v52 = vld [vmem:[%s6219_s9 + $0x4b] sm:$0xff] }
  0x8a   : > { %5797 = vmatprep.subr.msk.mxu1 %vm411_vm0, %v6585_v1  ;;  %5853 = vmatprep.subr.msk.mxu0 %vm411_vm0, %v6590_v46 }
  0x8b   : > { %5579 = vmatmul.mubr.msk.f32.gmra.mxu1 %vm302_vm1, %v6358_v54  ;;  %5635 = vmatmul.mubr.msk.f32.gmra.mxu0 %vm302_vm1, %v4706_v50  ;;  %v4711_v54 = vld [vmem:[%s6219_s9 + $0x53] sm:$0xff] }
  0x8c   : > { %5581 = vmatprep.mubr.msk.f32.mxu1 %vm302_vm1, %v6362_v56  ;;  %5637 = vmatprep.mubr.msk.f32.mxu0 %vm302_vm1, %v4707_v3  ;;  %v4712_v56 = vld [vmem:[%s6219_s9 + $0x5b] sm:$0xff] }
  0x8f   : > { %5582 = vmatmul.mubr.msk.f32.gmra.mxu1 %vm302_vm1, %v6372_v58  ;;  %5638 = vmatmul.mubr.msk.f32.gmra.mxu0 %vm302_vm1, %v4708_v47  ;;  %v4713_v58 = vld [vmem:[%s6219_s9 + $0x63] sm:$0xff] }
  0x90   : > { %5584 = vmatprep.mubr.msk.f32.mxu1 %vm302_vm1, %v6376_v60  ;;  %5640 = vmatprep.mubr.msk.f32.mxu0 %vm302_vm1, %v4709_v48  ;;  %v4714_v60 = vld [vmem:[%s6219_s9 + $0x6b] sm:$0xff]  ;;  %v4864_v47 = vld [vmem:[%s6219_s9 + $0x9c] sm:$0xff] }
  0x93   : > { %5585 = vmatmul.mubr.msk.f32.gmra.mxu1 %vm302_vm1, %v6386_v62  ;;  %5641 = vmatmul.mubr.msk.f32.gmra.mxu0 %vm302_vm1, %v4710_v52  ;;  %v4715_v62 = vld [vmem:[%s6219_s9 + $0x73] sm:$0xff] }
  0x94   : > { %5587 = vmatprep.mubr.msk.f32.mxu1 %vm302_vm1, %v6390_v0  ;;  %5643 = vmatprep.mubr.msk.f32.mxu0 %vm302_vm1, %v4711_v54  ;;  %v4716_v0 = vld [vmem:[%s6219_s9 + $0x7b] sm:$0xff]  ;;  %v4865_v54 = vld [vmem:[%s6219_s9 + $0xa4] sm:$0xff] }
  0x97   : > { %5588 = vmatmul.mubr.msk.f32.gmra.mxu1 %vm302_vm1, %v6400_v2  ;;  %5644 = vmatmul.mubr.msk.f32.gmra.mxu0 %vm302_vm1, %v4712_v56  ;;  %v4717_v2 = vld [vmem:[%s6219_s9 + $0x83] sm:$0xff] }
  0x98   : > { %5590 = vmatprep.mubr.msk.f32.mxu1 %vm302_vm1, %v6404_v4  ;;  %5646 = vmatprep.mubr.msk.f32.mxu0 %vm302_vm1, %v4713_v58  ;;  %v4718_v4 = vld [vmem:[%s6219_s9 + $0x8b] sm:$0xff] }
  0x9b   : > { %5591 = vmatmul.mubr.msk.f32.gmra.mxu1 %vm302_vm1, %v6414_v6  ;;  %5647 = vmatmul.mubr.msk.f32.gmra.mxu0 %vm302_vm1, %v4714_v60  ;;  %v4720_v6 = vld [vmem:[%s6219_s9 + $0x9b] sm:$0xff]  ;;  %v4866_v60 = vld [vmem:[%s6219_s9 + $0xac] sm:$0xff] }
  0x9c   : > { %5593 = vmatprep.mubr.msk.f32.mxu1 %vm302_vm1, %v6418_v8  ;;  %5649 = vmatprep.mubr.msk.f32.mxu0 %vm302_vm1, %v4715_v62  ;;  %v4722_v8 = vld [vmem:[%s6219_s9 + $0xab] sm:$0xff] }
  0x9f   : > { %5594 = vmatmul.mubr.msk.f32.gmra.mxu1 %vm302_vm1, %v6428_v10  ;;  %5650 = vmatmul.mubr.msk.f32.gmra.mxu0 %vm302_vm1, %v4716_v0  ;;  %v4724_v10 = vld [vmem:[%s6219_s9 + $0xbb] sm:$0xff] }
  0xa0   : > { %5596 = vmatprep.mubr.msk.f32.mxu1 %vm302_vm1, %v6432_v12  ;;  %5652 = vmatprep.mubr.msk.f32.mxu0 %vm302_vm1, %v4717_v2  ;;  %v4726_v12 = vld [vmem:[%s6219_s9 + $0xcb] sm:$0xff]  ;;  %v4867_v2 = vld [vmem:[%s6219_s9 + $0xb4] sm:$0xff] }
  0xa3   : > { %5597 = vmatmul.mubr.msk.f32.gmra.mxu1 %vm302_vm1, %v6442_v14  ;;  %5653 = vmatmul.mubr.msk.f32.gmra.mxu0 %vm302_vm1, %v4718_v4  ;;  %v4728_v14 = vld [vmem:[%s6219_s9 + $0xdb] sm:$0xff] }
  0xa4   : > { %5599 = vmatprep.mubr.msk.f32.mxu1 %vm302_vm1, %v6446_v16  ;;  %5655 = vmatprep.mubr.msk.f32.mxu0 %vm302_vm1, %v4719_v5  ;;  %v4730_v16 = vld [vmem:[%s6219_s9 + $0xeb] sm:$0xff] }
  0xa7   : > { %5600 = vmatmul.mubr.msk.f32.gmra.mxu1 %vm302_vm1, %v6456_v18  ;;  %5656 = vmatmul.mubr.msk.f32.gmra.mxu0 %vm302_vm1, %v4720_v6  ;;  %v4732_v18 = vld [vmem:[%s6219_s9 + $0xfb] sm:$0xff] }
  0xa8   : > { %5602 = vmatprep.mubr.msk.f32.mxu1 %vm302_vm1, %v6460_v20  ;;  %5658 = vmatprep.mubr.msk.f32.mxu0 %vm302_vm1, %v4721_v7  ;;  %v4734_v20 = vld [vmem:[%s6219_s9 + $0x10b] sm:$0xff]  ;;  %v4868_v6 = vld [vmem:[%s6219_s9 + $0xbc] sm:$0xff] }
  0xab   : > { %5603 = vmatmul.mubr.msk.f32.gmra.mxu1 %vm302_vm1, %v6470_v22  ;;  %5659 = vmatmul.mubr.msk.f32.gmra.mxu0 %vm302_vm1, %v4722_v8  ;;  %v4736_v22 = vld [vmem:[%s6219_s9 + $0x11b] sm:$0xff] }
  0xac   : > { %5605 = vmatprep.mubr.msk.f32.mxu1 %vm302_vm1, %v6474_v24  ;;  %5661 = vmatprep.mubr.msk.f32.mxu0 %vm302_vm1, %v4723_v9  ;;  %v4737_v24 = vld [vmem:[%s6219_s9 + $0x123] sm:$0xff] }
  0xad   : > { %v4869_v9 = vld [vmem:[%s6219_s9 + $0xc4] sm:$0xff] }
  0xaf   : > { %5606 = vmatmul.mubr.msk.f32.gmra.mxu1 %vm302_vm1, %v6484_v26  ;;  %5662 = vmatmul.mubr.msk.f32.gmra.mxu0 %vm302_vm1, %v4724_v10  ;;  %v4738_v26 = vld [vmem:[%s6219_s9 + $0x12b] sm:$0xff] }
  0xb0   : > { %5608 = vmatprep.mubr.msk.f32.mxu1 %vm302_vm1, %v6488_v28  ;;  %5664 = vmatprep.mubr.msk.f32.mxu0 %vm302_vm1, %v4725_v11  ;;  %v4849_v28 = vld [vmem:[%s6219_s9 + $0x24] sm:$0xff] }
  0xb3   : > { %5609 = vmatmul.mubr.msk.f32.gmra.mxu1 %vm302_vm1, %v6498_v30  ;;  %5665 = vmatmul.mubr.msk.f32.gmra.mxu0 %vm302_vm1, %v4726_v12  ;;  %v4850_v30 = vld [vmem:[%s6219_s9 + $0x2c] sm:$0xff] }
  0xb4   : > { %5611 = vmatprep.mubr.msk.f32.mxu1 %vm302_vm1, %v6502_v32  ;;  %5667 = vmatprep.mubr.msk.f32.mxu0 %vm302_vm1, %v4727_v13  ;;  %v4852_v32 = vld [vmem:[%s6219_s9 + $0x3c] sm:$0xff]  ;;  %v4870_v12 = vld [vmem:[%s6219_s9 + $0xcc] sm:$0xff] }
  0xb7   : > { %5612 = vmatmul.mubr.msk.f32.gmra.mxu1 %vm302_vm1, %v6512_v34  ;;  %5668 = vmatmul.mubr.msk.f32.gmra.mxu0 %vm302_vm1, %v4728_v14  ;;  %v4854_v34 = vld [vmem:[%s6219_s9 + $0x4c] sm:$0xff] }
  0xb8   : > { %5614 = vmatprep.mubr.msk.f32.mxu1 %vm302_vm1, %v6516_v36  ;;  %5670 = vmatprep.mubr.msk.f32.mxu0 %vm302_vm1, %v4729_v15  ;;  %v4856_v36 = vld [vmem:[%s6219_s9 + $0x5c] sm:$0xff]  ;;  %v4871_v15 = vld [vmem:[%s6219_s9 + $0xd4] sm:$0xff] }
  0xbb   : > { %5615 = vmatmul.mubr.msk.f32.gmra.mxu1 %vm302_vm1, %v6526_v38  ;;  %5671 = vmatmul.mubr.msk.f32.gmra.mxu0 %vm302_vm1, %v4730_v16 }
  0xbc   : > { %5617 = vmatprep.mubr.msk.f32.mxu1 %vm302_vm1, %v6530_v40  ;;  %5673 = vmatprep.mubr.msk.f32.mxu0 %vm302_vm1, %v4731_v17  ;;  %v4858_v40 = vld [vmem:[%s6219_s9 + $0x6c] sm:$0xff] }
  0xbf   : > { %5618 = vmatmul.mubr.msk.f32.gmra.mxu1 %vm302_vm1, %v6540_v42  ;;  %5674 = vmatmul.mubr.msk.f32.gmra.mxu0 %vm302_vm1, %v4732_v18  ;;  %v4872_v18 = vld [vmem:[%s6219_s9 + $0xdc] sm:$0xff] }
  0xc0   : > { %5620 = vmatprep.mubr.msk.f32.mxu1 %vm302_vm1, %v6544_v44  ;;  %5676 = vmatprep.mubr.msk.f32.mxu0 %vm302_vm1, %v4733_v19 }
  0xc3   : > { %5621 = vmatmul.mubr.msk.f32.gmra.mxu1 %vm302_vm1, %v6554_v49  ;;  %5677 = vmatmul.mubr.msk.f32.gmra.mxu0 %vm302_vm1, %v4734_v20  ;;  %v4860_v49 = vld [vmem:[%s6219_s9 + $0x7c] sm:$0xff] }
  0xc4   : > { %5623 = vmatprep.mubr.msk.f32.mxu1 %vm302_vm1, %v6558_v53  ;;  %5679 = vmatprep.mubr.msk.f32.mxu0 %vm302_vm1, %v4735_v21  ;;  %v4873_v21 = vld [vmem:[%s6219_s9 + $0xe4] sm:$0xff] }
  0xc7   : > { %5624 = vmatmul.mubr.msk.f32.gmra.mxu1 %vm302_vm1, %v6568_v57  ;;  %5680 = vmatmul.mubr.msk.f32.gmra.mxu0 %vm302_vm1, %v4736_v22 }
  0xc8   : > { %5626 = vmatprep.mubr.msk.f32.mxu1 %vm302_vm1, %v4664_v23  ;;  %5682 = vmatprep.mubr.msk.f32.mxu0 %vm302_vm1, %v4737_v24  ;;  %v4874_v24 = vld [vmem:[%s6219_s9 + $0xec] sm:$0xff] }
  0xcb   : > { %5627 = vmatmul.mubr.msk.f32.gmra.mxu1 %vm302_vm1, %v4665_v25  ;;  %5683 = vmatmul.mubr.msk.f32.gmra.mxu0 %vm302_vm1, %v4738_v26 }
  0xcc   : > { %5687 = vmatprep.mubr.msk.f32.mxu1 %vm302_vm1, %v4776_v27  ;;  %5743 = vmatprep.mubr.msk.f32.mxu0 %vm302_vm1, %v4849_v28  ;;  %v4875_v27 = vld [vmem:[%s6219_s9 + $0xf4] sm:$0xff] }
  0xcf   : > { %5688 = vmatmul.mubr.msk.f32.vlgmr.msra.gmra.mxu1 %vm302_vm1, %v4777_v29  ;;  %5744 = vmatmul.mubr.msk.f32.vlgmr.msra.gmra.mxu0 %vm302_vm1, %v4850_v30 }
  0xd0   : > { %5798 = vmatpush3.msk.msra.mxu1 %vm411_vm0, %v6585_v1  ;;  %5854 = vmatpush3.msk.msra.mxu0 %vm411_vm0, %v6590_v46  ;;  %v4863_v46 = vld [vmem:[%s6219_s9 + $0x94] sm:$0xff] }
  0xd1   : > { %5690 = vmatprep.mubr.msk.f32.mxu1 %vm302_vm1, %v4849_v28  ;;  %5746 = vmatprep.mubr.msk.f32.mxu0 %vm302_vm1, %v4851_v31 }
  0xd3   : > { %5691 = vmatmul.mubr.msk.f32.gmra.mxu1 %vm302_vm1, %v4850_v30  ;;  %5747 = vmatmul.mubr.msk.f32.gmra.mxu0 %vm302_vm1, %v4852_v32 }
  0xd4   : > { %5693 = vmatprep.mubr.msk.f32.mxu1 %vm302_vm1, %v4851_v31  ;;  %5749 = vmatprep.mubr.msk.f32.mxu0 %vm302_vm1, %v4853_v33  ;;  %v4876_v31 = vld [vmem:[%s6219_s9 + $0xfc] sm:$0xff] }
  0xd7   : > { %5694 = vmatmul.mubr.msk.f32.gmra.mxu1 %vm302_vm1, %v4852_v32  ;;  %5750 = vmatmul.mubr.msk.f32.gmra.mxu0 %vm302_vm1, %v4854_v34 }
  0xd8   : > { %5696 = vmatprep.mubr.msk.f32.mxu1 %vm302_vm1, %v4853_v33  ;;  %5752 = vmatprep.mubr.msk.f32.mxu0 %vm302_vm1, %v4855_v35 }
  0xdb   : > { %v6764_v38 = vpop.f32.mrf.mxu0  ;;  %v6766_v39 = vpop.f32.mrf.mxu1  ;;  %5697 = vmatmul.mubr.msk.f32.gmra.mxu1 %vm302_vm1, %v4854_v34  ;;  %5753 = vmatmul.mubr.msk.f32.gmra.mxu0 %vm302_vm1, %v4856_v36  ;;  %v4877_v34 = vld [vmem:[%s6219_s9 + $0x104] sm:$0xff] }
  0xdc   : > { %5699 = vmatprep.mubr.msk.f32.mxu1 %vm302_vm1, %v4855_v35  ;;  %5755 = vmatprep.mubr.msk.f32.mxu0 %vm302_vm1, %v4857_v37 }
  0xdd   : > { %v6773_v41 = vpop.f32.mrf.mxu0  ;;  %v6775_v42 = vpop.f32.mrf.mxu1 }
  0xdf   : > { %v6778_v44 = vpop.f32.mrf.mxu0  ;;  %v6780_v45 = vpop.f32.mrf.mxu1  ;;  %5700 = vmatmul.mubr.msk.f32.gmra.mxu1 %vm302_vm1, %v4856_v36  ;;  %5756 = vmatmul.mubr.msk.f32.gmra.mxu0 %vm302_vm1, %v4858_v40 }
  0xe0   : > { %5702 = vmatprep.mubr.msk.f32.mxu1 %vm302_vm1, %v4857_v37  ;;  %5758 = vmatprep.mubr.msk.f32.mxu0 %vm302_vm1, %v4859_v43 }
  0xe1   : > { %v6787_v51 = vpop.f32.mrf.mxu0  ;;  %v6789_v53 = vpop.f32.mrf.mxu1 }
  0xe3   : > { %v6792_v57 = vpop.f32.mrf.mxu0  ;;  %v6794_v59 = vpop.f32.mrf.mxu1  ;;  %5703 = vmatmul.mubr.msk.f32.gmra.mxu1 %vm302_vm1, %v4858_v40  ;;  %5759 = vmatmul.mubr.msk.f32.gmra.mxu0 %vm302_vm1, %v4860_v49 }
  0xe4   : > { %5705 = vmatprep.mubr.msk.f32.mxu1 %vm302_vm1, %v4859_v43  ;;  %5761 = vmatprep.mubr.msk.f32.mxu0 %vm302_vm1, %v4861_v55 }
  0xe5   : > { %v6801_v63 = vpop.f32.mrf.mxu0  ;;  %v6803_v1 = vpop.f32.mrf.mxu1 }
  0xe7   : > { %v6806_v50 = vpop.f32.mrf.mxu0  ;;  %v6808_v3 = vpop.f32.mrf.mxu1  ;;  %5706 = vmatmul.mubr.msk.f32.gmra.mxu1 %vm302_vm1, %v4860_v49  ;;  %5762 = vmatmul.mubr.msk.f32.gmra.mxu0 %vm302_vm1, %v4862_v61  ;;  %v4878_v49 = vld [vmem:[%s6219_s9 + $0x10c] sm:$0xff] }
  0xe8   : > { %5708 = vmatprep.mubr.msk.f32.mxu1 %vm302_vm1, %v4861_v55  ;;  %5764 = vmatprep.mubr.msk.f32.mxu0 %vm302_vm1, %v4863_v46 }
  0xe9   : > { %v6815_v48 = vpop.f32.mrf.mxu0  ;;  %v6817_v52 = vpop.f32.mrf.mxu1 }
  0xeb   : > { %v6820_v56 = vpop.f32.mrf.mxu0  ;;  %v6822_v58 = vpop.f32.mrf.mxu1  ;;  %5709 = vmatmul.mubr.msk.f32.gmra.mxu1 %vm302_vm1, %v4862_v61  ;;  %5765 = vmatmul.mubr.msk.f32.gmra.mxu0 %vm302_vm1, %v4864_v47 }
  0xec   : > { %5711 = vmatprep.mubr.msk.f32.mxu1 %vm302_vm1, %v4863_v46  ;;  %5767 = vmatprep.mubr.msk.f32.mxu0 %vm302_vm1, %v4865_v54 }
  0xed   : > { %v6829_v62 = vpop.f32.mrf.mxu0  ;;  %v6831_v0 = vpop.f32.mrf.mxu1 }
  0xef   : > { %v6834_v4 = vpop.f32.mrf.mxu0  ;;  %v6836_v5 = vpop.f32.mrf.mxu1  ;;  %5712 = vmatmul.mubr.msk.f32.gmra.mxu1 %vm302_vm1, %v4864_v47  ;;  %5768 = vmatmul.mubr.msk.f32.gmra.mxu0 %vm302_vm1, %v4866_v60 }
  0xf0   : > { %5714 = vmatprep.mubr.msk.f32.mxu1 %vm302_vm1, %v4865_v54  ;;  %5770 = vmatprep.mubr.msk.f32.mxu0 %vm302_vm1, %v4867_v2 }
  0xf1   : > { %v6843_v7 = vpop.f32.mrf.mxu0  ;;  %v6845_v8 = vpop.f32.mrf.mxu1 }
  0xf3   : > { %v6848_v10 = vpop.f32.mrf.mxu0  ;;  %v6850_v11 = vpop.f32.mrf.mxu1  ;;  %5715 = vmatmul.mubr.msk.f32.gmra.mxu1 %vm302_vm1, %v4866_v60  ;;  %5771 = vmatmul.mubr.msk.f32.gmra.mxu0 %vm302_vm1, %v4868_v6 }
  0xf4   : > { %5717 = vmatprep.mubr.msk.f32.mxu1 %vm302_vm1, %v4867_v2  ;;  %5773 = vmatprep.mubr.msk.f32.mxu0 %vm302_vm1, %v4869_v9 }
  0xf5   : > { %v6857_v13 = vpop.f32.mrf.mxu0  ;;  %v6859_v14 = vpop.f32.mrf.mxu1 }
  0xf7   : > { %v6862_v16 = vpop.f32.mrf.mxu0  ;;  %v6864_v17 = vpop.f32.mrf.mxu1  ;;  %5718 = vmatmul.mubr.msk.f32.gmra.mxu1 %vm302_vm1, %v4868_v6  ;;  %5774 = vmatmul.mubr.msk.f32.gmra.mxu0 %vm302_vm1, %v4870_v12  ;;  %v4880_v6 = vld [vmem:[%s6219_s9 + $0x11c] sm:$0xff] }
  0xf8   : > { %5720 = vmatprep.mubr.msk.f32.mxu1 %vm302_vm1, %v4869_v9  ;;  %5776 = vmatprep.mubr.msk.f32.mxu0 %vm302_vm1, %v4871_v15 }
  0xf9   : > { %v6871_v19 = vpop.f32.mrf.mxu0  ;;  %v6873_v20 = vpop.f32.mrf.mxu1 }
  0xfb   : > { %v6876_v22 = vpop.f32.mrf.mxu0  ;;  %v6878_v23 = vpop.f32.mrf.mxu1  ;;  %5721 = vmatmul.mubr.msk.f32.gmra.mxu1 %vm302_vm1, %v4870_v12  ;;  %5777 = vmatmul.mubr.msk.f32.gmra.mxu0 %vm302_vm1, %v4872_v18 }
  0xfc   : > { %5723 = vmatprep.mubr.msk.f32.mxu1 %vm302_vm1, %v4871_v15  ;;  %5779 = vmatprep.mubr.msk.f32.mxu0 %vm302_vm1, %v4873_v21 }
  0xfd   : > { %v6885_v25 = vpop.f32.mrf.mxu0  ;;  %v6887_v26 = vpop.f32.mrf.mxu1 }
  0xff   : > { %v5465_v28 = vpop.f32.mrf.mxu1  ;;  %v5521_v29 = vpop.f32.mrf.mxu0  ;;  %5724 = vmatmul.mubr.msk.f32.gmra.mxu1 %vm302_vm1, %v4872_v18  ;;  %5780 = vmatmul.mubr.msk.f32.gmra.mxu0 %vm302_vm1, %v4874_v24 }
 0x100   : > { %v843_v30 = vadd.f32 %v5465_v28, %v6764_v38  ;;  %5726 = vmatprep.mubr.msk.f32.mxu1 %vm302_vm1, %v4873_v21  ;;  %5782 = vmatprep.mubr.msk.f32.mxu0 %vm302_vm1, %v4875_v27  ;;  %v4882_v28 = vld [vmem:[%s6219_s9 + $0x12c] sm:$0xff] }
 0x101   : > { %v837_v32 = vpop.f32.mrf.mxu1  ;;  %v1232_v33 = vpop.f32.mrf.mxu0 }
 0x102   : > { %v6897_v35 = vadd.f32 %v5521_v29, %v843_v30  ;;  %v838_v36 = vadd.f32 %v837_v32, %v6773_v41  ;;  %v4879_v41 = vld [vmem:[%s6219_s9 + $0x114] sm:$0xff] }
 0x103   : > { %v5468_v37 = vpop.f32.mrf.mxu1  ;;  %v5524_v40 = vpop.f32.mrf.mxu0  ;;  %5727 = vmatmul.mubr.msk.f32.gmra.mxu1 %vm302_vm1, %v4874_v24  ;;  %5783 = vmatmul.mubr.msk.f32.gmra.mxu0 %vm302_vm1, %v4876_v31 }
 0x104   : > { %v6902_v38 = vadd.f32 %v1232_v33, %v838_v36  ;;  %v853_v43 = vadd.f32 %v5468_v37, %v6778_v44  ;;  %5729 = vmatprep.mubr.msk.f32.mxu1 %vm302_vm1, %v4875_v27  ;;  %5785 = vmatprep.mubr.msk.f32.mxu0 %vm302_vm1, %v4877_v34  ;;  %v4884_v37 = vld [vmem:[%s6219_s9 + $0x13c] sm:$0xff] }
 0x105   : > { %v847_v55 = vpop.f32.mrf.mxu1  ;;  %v1242_v61 = vpop.f32.mrf.mxu0 }
 0x106   : > { %v6909_v46 = vadd.f32 %v5524_v40, %v853_v43  ;;  %v848_v47 = vadd.f32 %v847_v55, %v6787_v51  ;;  %v4881_v51 = vld [vmem:[%s6219_s9 + $0x124] sm:$0xff] }
 0x107   : > { %v5471_v54 = vpop.f32.mrf.mxu1  ;;  %v5527_v60 = vpop.f32.mrf.mxu0  ;;  %5730 = vmatmul.mubr.msk.f32.gmra.mxu1 %vm302_vm1, %v4876_v31  ;;  %5786 = vmatmul.mubr.msk.f32.gmra.mxu0 %vm302_vm1, %v4878_v49 }
 0x108   : > { %v6914_v44 = vadd.f32 %v1242_v61, %v848_v47  ;;  %v863_v2 = vadd.f32 %v5471_v54, %v6792_v57  ;;  %5732 = vmatprep.mubr.msk.f32.mxu1 %vm302_vm1, %v4877_v34  ;;  %5788 = vmatprep.mubr.msk.f32.mxu0 %vm302_vm1, %v4879_v41 }
 0x109   : > { %v857_v9 = vpop.f32.mrf.mxu1  ;;  %v1252_v12 = vpop.f32.mrf.mxu0 }
 0x10a   : > { %v6921_v15 = vadd.f32 %v5527_v60, %v863_v2  ;;  %v858_v18 = vadd.f32 %v857_v9, %v6801_v63  ;;  %v4883_v63 = vld [vmem:[%s6219_s9 + $0x134] sm:$0xff] }
 0x10b   : > { %v5474_v21 = vpop.f32.mrf.mxu1  ;;  %v5530_v24 = vpop.f32.mrf.mxu0  ;;  %5733 = vmatmul.mubr.msk.f32.gmra.mxu1 %vm302_vm1, %v4878_v49  ;;  %5789 = vmatmul.mubr.msk.f32.gmra.mxu0 %vm302_vm1, %v4880_v6  ;;  %v4995_v49 = vld [vmem:[%s6219_s9 + $0x26] sm:$0xff]  ;;  %v4996_v2 = vld [vmem:[%s6219_s9 + $0x2e] sm:$0xff] }
 0x10c   : > { %v6926_v57 = vadd.f32 %v1252_v12, %v858_v18  ;;  %v873_v27 = vadd.f32 %v5474_v21, %v6806_v50  ;;  %5735 = vmatprep.mubr.msk.f32.mxu1 %vm302_vm1, %v4879_v41  ;;  %5791 = vmatprep.mubr.msk.f32.mxu0 %vm302_vm1, %v4881_v51  ;;  %v4923_v60 = vld [vmem:[%s6219_s9 + $0x2d] sm:$0xff]  ;;  %v4924_v9 = vld [vmem:[%s6219_s9 + $0x35] sm:$0xff] }
 0x10d   : > { %v867_v29 = vpop.f32.mrf.mxu1  ;;  %v1262_v30 = vpop.f32.mrf.mxu0  ;;  %v4997_v12 = vld [vmem:[%s6219_s9 + $0x36] sm:$0xff] }
 0x10e   : > { %v6933_v31 = vadd.f32 %v5530_v24, %v873_v27  ;;  %v868_v32 = vadd.f32 %v867_v29, %v6815_v48  ;;  %v4922_v48 = vld [vmem:[%s6219_s9 + $0x25] sm:$0xff] }
 0x10f   : > { %v5477_v33 = vpop.f32.mrf.mxu1  ;;  %v5533_v34 = vpop.f32.mrf.mxu0  ;;  %5736 = vmatmul.mubr.msk.f32.gmra.mxu1 %vm302_vm1, %v4880_v6  ;;  %5792 = vmatmul.mubr.msk.f32.gmra.mxu0 %vm302_vm1, %v4882_v28  ;;  %v4998_v29 = vld [vmem:[%s6219_s9 + $0x3e] sm:$0xff] }
 0x110   : > { %v6938_v50 = vadd.f32 %v1262_v30, %v868_v32  ;;  %v883_v36 = vadd.f32 %v5477_v33, %v6820_v56  ;;  %5738 = vmatprep.mubr.msk.f32.mxu1 %vm302_vm1, %v4881_v51  ;;  %5794 = vmatprep.mubr.msk.f32.mxu0 %vm302_vm1, %v4883_v63  ;;  %v4926_v63 = vld [vmem:[%s6219_s9 + $0x45] sm:$0xff] }
 0x111   : > { %v877_v40 = vpop.f32.mrf.mxu1  ;;  %v1272_v43 = vpop.f32.mrf.mxu0  ;;  %v4999_v32 = vld [vmem:[%s6219_s9 + $0x46] sm:$0xff] }
 0x112   : > { %v6946_v55 = vadd.f32 %v5533_v34, %v883_v36  ;;  %v878_v61 = vadd.f32 %v877_v40, %v6829_v62 }
 0x113   : > { %v5480_v41 = vpop.f32.mrf.mxu1  ;;  %v5536_v47 = vpop.f32.mrf.mxu0  ;;  %5739 = vmatmul.mubr.msk.f32.gmra.mxu1 %vm302_vm1, %v4882_v28  ;;  %5795 = vmatmul.mubr.msk.f32.gmra.mxu0 %vm302_vm1, %v4884_v37  ;;  %v4925_v28 = vld [vmem:[%s6219_s9 + $0x3d] sm:$0xff] }
 0x114   : > { %v6951_v56 = vadd.f32 %v1272_v43, %v878_v61  ;;  %v893_v54 = vadd.f32 %v5480_v41, %v6834_v4  ;;  %5799 = vmatprep.mubr.msk.f32.mxu1 %vm302_vm1, %v4922_v48  ;;  %5855 = vmatprep.mubr.msk.f32.mxu0 %vm302_vm1, %v4995_v49  ;;  %v4927_v43 = vld [vmem:[%s6219_s9 + $0x4d] sm:$0xff]  ;;  %v4928_v61 = vld [vmem:[%s6219_s9 + $0x55] sm:$0xff] }
 0x115   : > { %v887_v6 = vpop.f32.mrf.mxu1  ;;  %v1282_v62 = vpop.f32.mrf.mxu0  ;;  %v5000_v48 = vld [vmem:[%s6219_s9 + $0x4e] sm:$0xff]  ;;  %v5001_v41 = vld [vmem:[%s6219_s9 + $0x56] sm:$0xff] }
 0x116   : > { %v6960_v51 = vadd.f32 %v5536_v47, %v893_v54  ;;  %v888_v18 = vadd.f32 %v887_v6, %v6843_v7 }
 0x117   : > { %v5483_v21 = vpop.f32.mrf.mxu1  ;;  %v5539_v4 = vpop.f32.mrf.mxu0  ;;  %5800 = vmatmul.mubr.msk.f32.vlgmr.msra.gmra.mxu1 %vm302_vm1, %v4923_v60  ;;  %5856 = vmatmul.mubr.msk.f32.vlgmr.msra.gmra.mxu0 %vm302_vm1, %v4996_v2 }
 0x118   : > { %v6965_v24 = vadd.f32 %v1282_v62, %v888_v18  ;;  %v903_v27 = vadd.f32 %v5483_v21, %v6848_v10  ;;  %5802 = vmatprep.mubr.msk.f32.mxu1 %vm302_vm1, %v4924_v9  ;;  %5858 = vmatprep.mubr.msk.f32.mxu0 %vm302_vm1, %v4997_v12  ;;  %v4929_v62 = vld [vmem:[%s6219_s9 + $0x5d] sm:$0xff]  ;;  %v4930_v18 = vld [vmem:[%s6219_s9 + $0x65] sm:$0xff] }
 0x119   : > { %v897_v30 = vpop.f32.mrf.mxu1  ;;  %v1292_v7 = vpop.f32.mrf.mxu0  ;;  %v5002_v9 = vld [vmem:[%s6219_s9 + $0x5e] sm:$0xff]  ;;  %v5003_v21 = vld [vmem:[%s6219_s9 + $0x66] sm:$0xff] }
 0x11a   : > { %v6974_v33 = vadd.f32 %v5539_v4, %v903_v27  ;;  %v898_v34 = vadd.f32 %v897_v30, %v6857_v13 }
 0x11b   : > { %v5486_v36 = vpop.f32.mrf.mxu1  ;;  %v5542_v10 = vpop.f32.mrf.mxu0  ;;  %5803 = vmatmul.mubr.msk.f32.gmra.mxu1 %vm302_vm1, %v4925_v28  ;;  %5859 = vmatmul.mubr.msk.f32.gmra.mxu0 %vm302_vm1, %v4998_v29 }
 0x11c   : > { %v6979_v37 = vadd.f32 %v1292_v7, %v898_v34  ;;  %v913_v40 = vadd.f32 %v5486_v36, %v6862_v16  ;;  %5805 = vmatprep.mubr.msk.f32.mxu1 %vm302_vm1, %v4926_v63  ;;  %5861 = vmatprep.mubr.msk.f32.mxu0 %vm302_vm1, %v4999_v32  ;;  %v4931_v7 = vld [vmem:[%s6219_s9 + $0x6d] sm:$0xff]  ;;  %v4932_v34 = vld [vmem:[%s6219_s9 + $0x75] sm:$0xff] }
 0x11d   : > { %v907_v49 = vpop.f32.mrf.mxu1  ;;  %v1302_v13 = vpop.f32.mrf.mxu0  ;;  %v5004_v63 = vld [vmem:[%s6219_s9 + $0x6e] sm:$0xff]  ;;  %v5005_v36 = vld [vmem:[%s6219_s9 + $0x76] sm:$0xff] }
 0x11e   : > { %v6988_v47 = vadd.f32 %v5542_v10, %v913_v40  ;;  %v908_v54 = vadd.f32 %v907_v49, %v6871_v19 }
 0x11f   : > { %v5489_v60 = vpop.f32.mrf.mxu1  ;;  %v5545_v16 = vpop.f32.mrf.mxu0  ;;  %5806 = vmatmul.mubr.msk.f32.gmra.mxu1 %vm302_vm1, %v4927_v43  ;;  %5862 = vmatmul.mubr.msk.f32.gmra.mxu0 %vm302_vm1, %v5000_v48 }
 0x120   : > { %v6993_v2 = vadd.f32 %v1302_v13, %v908_v54  ;;  %v923_v6 = vadd.f32 %v5489_v60, %v6876_v22  ;;  %5808 = vmatprep.mubr.msk.f32.mxu1 %vm302_vm1, %v4928_v61  ;;  %5864 = vmatprep.mubr.msk.f32.mxu0 %vm302_vm1, %v5001_v41  ;;  %v4933_v13 = vld [vmem:[%s6219_s9 + $0x7d] sm:$0xff]  ;;  %v4934_v54 = vld [vmem:[%s6219_s9 + $0x85] sm:$0xff] }
 0x121   : > { %v917_v12 = vpop.f32.mrf.mxu1  ;;  %v1312_v19 = vpop.f32.mrf.mxu0  ;;  %v5006_v61 = vld [vmem:[%s6219_s9 + $0x7e] sm:$0xff]  ;;  %v5007_v60 = vld [vmem:[%s6219_s9 + $0x86] sm:$0xff] }
 0x122   : > { %v7002_v4 = vadd.f32 %v5545_v16, %v923_v6  ;;  %v918_v27 = vadd.f32 %v917_v12, %v6885_v25 }
 0x123   : > { %v5492_v28 = vpop.f32.mrf.mxu1  ;;  %v5548_v22 = vpop.f32.mrf.mxu0  ;;  %5809 = vmatmul.mubr.msk.f32.gmra.mxu1 %vm302_vm1, %v4929_v62  ;;  %5865 = vmatmul.mubr.msk.f32.gmra.mxu0 %vm302_vm1, %v5002_v9 }
 0x124   : > { %v7007_v29 = vadd.f32 %v1312_v19, %v918_v27  ;;  %v933_v30 = vadd.f32 %v5492_v28, %v6766_v39  ;;  %5811 = vmatprep.mubr.msk.f32.mxu1 %vm302_vm1, %v4930_v18  ;;  %5867 = vmatprep.mubr.msk.f32.mxu0 %vm302_vm1, %v5003_v21  ;;  %v4935_v19 = vld [vmem:[%s6219_s9 + $0x8d] sm:$0xff]  ;;  %v4936_v27 = vld [vmem:[%s6219_s9 + $0x95] sm:$0xff] }
 0x125   : > { %v927_v32 = vpop.f32.mrf.mxu1  ;;  %v1322_v25 = vpop.f32.mrf.mxu0  ;;  %v5008_v18 = vld [vmem:[%s6219_s9 + $0x8e] sm:$0xff]  ;;  %v5009_v28 = vld [vmem:[%s6219_s9 + $0x96] sm:$0xff] }
 0x126   : > { %v7016_v10 = vadd.f32 %v5548_v22, %v933_v30  ;;  %v928_v40 = vadd.f32 %v927_v32, %v6775_v42 }
 0x127   : > { %v5495_v43 = vpop.f32.mrf.mxu1  ;;  %v5551_v39 = vpop.f32.mrf.mxu0  ;;  %5812 = vmatmul.mubr.msk.f32.gmra.mxu1 %vm302_vm1, %v4931_v7  ;;  %5868 = vmatmul.mubr.msk.f32.gmra.mxu0 %vm302_vm1, %v5004_v63 }
 0x128   : > { %v7021_v48 = vadd.f32 %v1322_v25, %v928_v40  ;;  %v943_v49 = vadd.f32 %v5495_v43, %v6780_v45  ;;  %5814 = vmatprep.mubr.msk.f32.mxu1 %vm302_vm1, %v4932_v34  ;;  %5870 = vmatprep.mubr.msk.f32.mxu0 %vm302_vm1, %v5005_v36  ;;  %v4937_v25 = vld [vmem:[%s6219_s9 + $0x9d] sm:$0xff]  ;;  %v4938_v40 = vld [vmem:[%s6219_s9 + $0xa5] sm:$0xff] }
 0x129   : > { %v937_v41 = vpop.f32.mrf.mxu1  ;;  %v1332_v42 = vpop.f32.mrf.mxu0  ;;  %v5010_v34 = vld [vmem:[%s6219_s9 + $0x9e] sm:$0xff]  ;;  %v5011_v43 = vld [vmem:[%s6219_s9 + $0xa6] sm:$0xff] }
 0x12a   : > { %v7030_v16 = vadd.f32 %v5551_v39, %v943_v49  ;;  %v938_v6 = vadd.f32 %v937_v41, %v6789_v53 }
 0x12b   : > { %v5498_v62 = vpop.f32.mrf.mxu1  ;;  %v5554_v45 = vpop.f32.mrf.mxu0  ;;  %5815 = vmatmul.mubr.msk.f32.gmra.mxu1 %vm302_vm1, %v4933_v13  ;;  %5871 = vmatmul.mubr.msk.f32.gmra.mxu0 %vm302_vm1, %v5006_v61 }
 0x12c   : > { %v7035_v9 = vadd.f32 %v1332_v42, %v938_v6  ;;  %v953_v12 = vadd.f32 %v5498_v62, %v6794_v59  ;;  %5817 = vmatprep.mubr.msk.f32.mxu1 %vm302_vm1, %v4934_v54  ;;  %5873 = vmatprep.mubr.msk.f32.mxu0 %vm302_vm1, %v5007_v60  ;;  %v4939_v42 = vld [vmem:[%s6219_s9 + $0xad] sm:$0xff]  ;;  %v4940_v6 = vld [vmem:[%s6219_s9 + $0xb5] sm:$0xff] }
 0x12d   : > { %v947_v21 = vpop.f32.mrf.mxu1  ;;  %v1342_v53 = vpop.f32.mrf.mxu0  ;;  %v5012_v54 = vld [vmem:[%s6219_s9 + $0xae] sm:$0xff]  ;;  %v5013_v62 = vld [vmem:[%s6219_s9 + $0xb6] sm:$0xff] }
 0x12e   : > { %v7044_v22 = vadd.f32 %v5554_v45, %v953_v12  ;;  %v948_v30 = vadd.f32 %v947_v21, %v6803_v1 }
 0x12f   : > { %v5501_v7 = vpop.f32.mrf.mxu1  ;;  %v5557_v59 = vpop.f32.mrf.mxu0  ;;  %5818 = vmatmul.mubr.msk.f32.gmra.mxu1 %vm302_vm1, %v4935_v19  ;;  %5874 = vmatmul.mubr.msk.f32.gmra.mxu0 %vm302_vm1, %v5008_v18 }
 0x130   : > { %v7049_v63 = vadd.f32 %v1342_v53, %v948_v30  ;;  %v963_v32 = vadd.f32 %v5501_v7, %v6808_v3  ;;  %5820 = vmatprep.mubr.msk.f32.mxu1 %vm302_vm1, %v4936_v27  ;;  %5876 = vmatprep.mubr.msk.f32.mxu0 %vm302_vm1, %v5009_v28  ;;  %v4941_v53 = vld [vmem:[%s6219_s9 + $0xbd] sm:$0xff]  ;;  %v4942_v30 = vld [vmem:[%s6219_s9 + $0xc5] sm:$0xff] }
 0x131   : > { %v957_v36 = vpop.f32.mrf.mxu1  ;;  %v1352_v1 = vpop.f32.mrf.mxu0  ;;  %v5014_v27 = vld [vmem:[%s6219_s9 + $0xbe] sm:$0xff]  ;;  %v5015_v7 = vld [vmem:[%s6219_s9 + $0xc6] sm:$0xff] }
 0x132   : > { %v7058_v39 = vadd.f32 %v5557_v59, %v963_v32  ;;  %v958_v49 = vadd.f32 %v957_v36, %v6817_v52 }
 0x133   : > { %v5504_v13 = vpop.f32.mrf.mxu1  ;;  %v5560_v3 = vpop.f32.mrf.mxu0  ;;  %5821 = vmatmul.mubr.msk.f32.gmra.mxu1 %vm302_vm1, %v4937_v25  ;;  %5877 = vmatmul.mubr.msk.f32.gmra.mxu0 %vm302_vm1, %v5010_v34 }
 0x134   : > { %v7063_v61 = vadd.f32 %v1352_v1, %v958_v49  ;;  %v973_v41 = vadd.f32 %v5504_v13, %v6822_v58  ;;  %5823 = vmatprep.mubr.msk.f32.mxu1 %vm302_vm1, %v4938_v40  ;;  %5879 = vmatprep.mubr.msk.f32.mxu0 %vm302_vm1, %v5011_v43  ;;  %v4943_v1 = vld [vmem:[%s6219_s9 + $0xcd] sm:$0xff]  ;;  %v4944_v49 = vld [vmem:[%s6219_s9 + $0xd5] sm:$0xff] }
 0x135   : > { %v967_v60 = vpop.f32.mrf.mxu1  ;;  %v1362_v52 = vpop.f32.mrf.mxu0  ;;  %v5016_v40 = vld [vmem:[%s6219_s9 + $0xce] sm:$0xff]  ;;  %v5017_v13 = vld [vmem:[%s6219_s9 + $0xd6] sm:$0xff] }
 0x136   : > { %v7072_v45 = vadd.f32 %v5560_v3, %v973_v41  ;;  %v968_v12 = vadd.f32 %v967_v60, %v6831_v0 }
 0x137   : > { %v5507_v19 = vpop.f32.mrf.mxu1  ;;  %v5563_v58 = vpop.f32.mrf.mxu0  ;;  %5824 = vmatmul.mubr.msk.f32.gmra.mxu1 %vm302_vm1, %v4939_v42  ;;  %5880 = vmatmul.mubr.msk.f32.gmra.mxu0 %vm302_vm1, %v5012_v54 }
 0x138   : > { %v7077_v18 = vadd.f32 %v1362_v52, %v968_v12  ;;  %v983_v21 = vadd.f32 %v5507_v19, %v6836_v5  ;;  %5826 = vmatprep.mubr.msk.f32.mxu1 %vm302_vm1, %v4940_v6  ;;  %5882 = vmatprep.mubr.msk.f32.mxu0 %vm302_vm1, %v5013_v62  ;;  %v4945_v52 = vld [vmem:[%s6219_s9 + $0xdd] sm:$0xff]  ;;  %v4946_v12 = vld [vmem:[%s6219_s9 + $0xe5] sm:$0xff] }
 0x139   : > { %v977_v28 = vpop.f32.mrf.mxu1  ;;  %v1372_v0 = vpop.f32.mrf.mxu0  ;;  %v5018_v6 = vld [vmem:[%s6219_s9 + $0xde] sm:$0xff]  ;;  %v5019_v19 = vld [vmem:[%s6219_s9 + $0xe6] sm:$0xff] }
 0x13a   : > { %v7086_v59 = vadd.f32 %v5563_v58, %v983_v21  ;;  %v978_v32 = vadd.f32 %v977_v28, %v6845_v8 }
 0x13b   : > { %v5510_v25 = vpop.f32.mrf.mxu1  ;;  %v5566_v5 = vpop.f32.mrf.mxu0  ;;  %5827 = vmatmul.mubr.msk.f32.gmra.mxu1 %vm302_vm1, %v4941_v53  ;;  %5883 = vmatmul.mubr.msk.f32.gmra.mxu0 %vm302_vm1, %v5014_v27 }
 0x13c   : > { %v7091_v34 = vadd.f32 %v1372_v0, %v978_v32  ;;  %v993_v36 = vadd.f32 %v5510_v25, %v6850_v11  ;;  %5829 = vmatprep.mubr.msk.f32.mxu1 %vm302_vm1, %v4942_v30  ;;  %5885 = vmatprep.mubr.msk.f32.mxu0 %vm302_vm1, %v5015_v7  ;;  %v4947_v0 = vld [vmem:[%s6219_s9 + $0xed] sm:$0xff]  ;;  %v4948_v32 = vld [vmem:[%s6219_s9 + $0xf5] sm:$0xff] }
 0x13d   : > { %v987_v43 = vpop.f32.mrf.mxu1  ;;  %v1382_v8 = vpop.f32.mrf.mxu0  ;;  %v5020_v30 = vld [vmem:[%s6219_s9 + $0xee] sm:$0xff]  ;;  %v5021_v25 = vld [vmem:[%s6219_s9 + $0xf6] sm:$0xff] }
 0x13e   : > { %v7100_v3 = vadd.f32 %v5566_v5, %v993_v36  ;;  %v988_v41 = vadd.f32 %v987_v43, %v6859_v14 }
 0x13f   : > { %v5513_v42 = vpop.f32.mrf.mxu1  ;;  %v5569_v11 = vpop.f32.mrf.mxu0  ;;  %5830 = vmatmul.mubr.msk.f32.gmra.mxu1 %vm302_vm1, %v4943_v1  ;;  %5886 = vmatmul.mubr.msk.f32.gmra.mxu0 %vm302_vm1, %v5016_v40 }
 0x140   : > { %v7105_v54 = vadd.f32 %v1382_v8, %v988_v41  ;;  %v1003_v60 = vadd.f32 %v5513_v42, %v6864_v17  ;;  %5832 = vmatprep.mubr.msk.f32.mxu1 %vm302_vm1, %v4944_v49  ;;  %5888 = vmatprep.mubr.msk.f32.mxu0 %vm302_vm1, %v5017_v13  ;;  %v4949_v8 = vld [vmem:[%s6219_s9 + $0xfd] sm:$0xff]  ;;  %v4950_v41 = vld [vmem:[%s6219_s9 + $0x105] sm:$0xff] }
 0x141   : > { %v997_v62 = vpop.f32.mrf.mxu1  ;;  %v1392_v14 = vpop.f32.mrf.mxu0  ;;  %v5022_v49 = vld [vmem:[%s6219_s9 + $0xfe] sm:$0xff]  ;;  %v5023_v42 = vld [vmem:[%s6219_s9 + $0x106] sm:$0xff] }
 0x142   : > { %v7114_v58 = vadd.f32 %v5569_v11, %v1003_v60  ;;  %v998_v21 = vadd.f32 %v997_v62, %v6873_v20 }
 0x143   : > { %v5516_v53 = vpop.f32.mrf.mxu1  ;;  %v5572_v17 = vpop.f32.mrf.mxu0  ;;  %5833 = vmatmul.mubr.msk.f32.gmra.mxu1 %vm302_vm1, %v4945_v52  ;;  %5889 = vmatmul.mubr.msk.f32.gmra.mxu0 %vm302_vm1, %v5018_v6 }
 0x144   : > { %v7119_v27 = vadd.f32 %v1392_v14, %v998_v21  ;;  %v1013_v28 = vadd.f32 %v5516_v53, %v6878_v23  ;;  %5835 = vmatprep.mubr.msk.f32.mxu1 %vm302_vm1, %v4946_v12  ;;  %5891 = vmatprep.mubr.msk.f32.mxu0 %vm302_vm1, %v5019_v19  ;;  %v4951_v14 = vld [vmem:[%s6219_s9 + $0x10d] sm:$0xff]  ;;  %v4952_v21 = vld [vmem:[%s6219_s9 + $0x115] sm:$0xff] }
 0x145   : > { %v1007_v7 = vpop.f32.mrf.mxu1  ;;  %v1402_v20 = vpop.f32.mrf.mxu0  ;;  %v5024_v12 = vld [vmem:[%s6219_s9 + $0x10e] sm:$0xff]  ;;  %v5025_v53 = vld [vmem:[%s6219_s9 + $0x116] sm:$0xff] }
 0x146   : > { %v7128_v5 = vadd.f32 %v5572_v17, %v1013_v28  ;;  %v1008_v36 = vadd.f32 %v1007_v7, %v6887_v26 }
 0x147   : > { %v5577_v1 = vpop.f32.mrf.mxu1  ;;  %v5633_v23 = vpop.f32.mrf.mxu0  ;;  %5836 = vmatmul.mubr.msk.f32.gmra.mxu1 %vm302_vm1, %v4947_v0  ;;  %5892 = vmatmul.mubr.msk.f32.gmra.mxu0 %vm302_vm1, %v5020_v30 }
 0x148   : > { %v7133_v40 = vadd.f32 %v1402_v20, %v1008_v36  ;;  %v1843_v43 = vadd.f32 %v5577_v1, %v6897_v35  ;;  %5838 = vmatprep.mubr.msk.f32.mxu1 %vm302_vm1, %v4948_v32  ;;  %5894 = vmatprep.mubr.msk.f32.mxu0 %vm302_vm1, %v5021_v25  ;;  %v4953_v20 = vld [vmem:[%s6219_s9 + $0x11d] sm:$0xff]  ;;  %v4954_v36 = vld [vmem:[%s6219_s9 + $0x125] sm:$0xff] }
 0x149   : > { %v1663_v13 = vpop.f32.mrf.mxu1  ;;  %v2094_v26 = vpop.f32.mrf.mxu0  ;;  %v5026_v32 = vld [vmem:[%s6219_s9 + $0x11e] sm:$0xff]  ;;  %v5027_v1 = vld [vmem:[%s6219_s9 + $0x126] sm:$0xff] }
 0x14a   : > { %v7142_v11 = vadd.f32 %v5633_v23, %v1843_v43  ;;  %v1842_v60 = vadd.f32 %v1663_v13, %v6902_v38 }
 0x14b   : > { %v5580_v52 = vpop.f32.mrf.mxu1  ;;  %v5636_v35 = vpop.f32.mrf.mxu0  ;;  %5839 = vmatmul.mubr.msk.f32.gmra.mxu1 %vm302_vm1, %v4949_v8  ;;  %5895 = vmatmul.mubr.msk.f32.gmra.mxu0 %vm302_vm1, %v5022_v49 }
 0x14c   : > { %v7147_v6 = vadd.f32 %v2094_v26, %v1842_v60  ;;  %v1845_v62 = vadd.f32 %v5580_v52, %v6909_v46  ;;  %5841 = vmatprep.mubr.msk.f32.mxu1 %vm302_vm1, %v4950_v41  ;;  %5897 = vmatprep.mubr.msk.f32.mxu0 %vm302_vm1, %v5023_v42  ;;  %v4955_v26 = vld [vmem:[%s6219_s9 + $0x12d] sm:$0xff]  ;;  %v4956_v60 = vld [vmem:[%s6219_s9 + $0x135] sm:$0xff] }
 0x14d   : > { %v1673_v19 = vpop.f32.mrf.mxu1  ;;  %v2104_v38 = vpop.f32.mrf.mxu0  ;;  %v5028_v41 = vld [vmem:[%s6219_s9 + $0x12e] sm:$0xff]  ;;  %v5029_v52 = vld [vmem:[%s6219_s9 + $0x136] sm:$0xff] }
 0x14e   : > { %v7156_v17 = vadd.f32 %v5636_v35, %v1845_v62  ;;  %v1844_v28 = vadd.f32 %v1673_v19, %v6914_v44 }
 0x14f   : > { %v5583_v0 = vpop.f32.mrf.mxu1  ;;  %v5639_v46 = vpop.f32.mrf.mxu0  ;;  %5842 = vmatmul.mubr.msk.f32.gmra.mxu1 %vm302_vm1, %v4951_v14  ;;  %5898 = vmatmul.mubr.msk.f32.gmra.mxu0 %vm302_vm1, %v5024_v12 }
 0x150   : > { %v7161_v30 = vadd.f32 %v2104_v38, %v1844_v28  ;;  %v1847_v7 = vadd.f32 %v5583_v0, %v6921_v15  ;;  %5844 = vmatprep.mubr.msk.f32.mxu1 %vm302_vm1, %v4952_v21  ;;  %5900 = vmatprep.mubr.msk.f32.mxu0 %vm302_vm1, %v5025_v53  ;;  %v4957_v38 = vld [vmem:[%s6219_s9 + $0x13d] sm:$0xff] }
 0x151   : > { %v1683_v25 = vpop.f32.mrf.mxu1  ;;  %v2114_v44 = vpop.f32.mrf.mxu0  ;;  %v5030_v21 = vld [vmem:[%s6219_s9 + $0x13e] sm:$0xff]  ;;  %s7462_s9 = scalar_lea.vmem [#allocation2], %s7443_s8 }
 0x152   : > { %v7170_v23 = vadd.f32 %v5639_v46, %v1847_v7  ;;  %v1846_v43 = vadd.f32 %v1683_v25, %v6926_v57  ;;  %s4309_s11 = sshll.u32 %s7462_s9, 4  ;;  %s7652_s11 = int_to_ptr.vmem [resolvable:$true] %s4309_s11 }
 0x153   : > { %v5586_v8 = vpop.f32.mrf.mxu1  ;;  %v5642_v15 = vpop.f32.mrf.mxu0  ;;  %5845 = vmatmul.mubr.msk.f32.gmra.mxu1 %vm302_vm1, %v4953_v20  ;;  %5901 = vmatmul.mubr.msk.f32.gmra.mxu0 %vm302_vm1, %v5026_v32  ;;  %s6043_s23 = scalar_lea.vmem %s7652_s11, 4608  ;;  %p6050_p1 = scmp.lt.s32.totalorder %s7652_s11, %s6048_s27 }
 0x154   : > { %v7175_v49 = vadd.f32 %v2114_v44, %v1846_v43  ;;  %v1849_v13 = vadd.f32 %v5586_v8, %v6933_v31  ;;  %5847 = vmatprep.mubr.msk.f32.mxu1 %vm302_vm1, %v4954_v36  ;;  %5903 = vmatprep.mubr.msk.f32.mxu0 %vm302_vm1, %v5027_v1  ;;  %p6044_p12 = scmp.ne.s32.totalorder %s7652_s11, %s6043_s23  ;;  %p6051_p2 = scmp.lt.s32.totalorder %s6049_s28, %s6043_s23 }
 0x155   : > { %v1693_v42 = vpop.f32.mrf.mxu1  ;;  %v2124_v57 = vpop.f32.mrf.mxu0 }
 0x156   : > { %v7184_v35 = vadd.f32 %v5642_v15, %v1849_v13  ;;  %v1848_v62 = vadd.f32 %v1693_v42, %v6938_v50  ;;  %p6045_p13 = pnand %p6044_p12, %p6184_p4  ;;  %p6052_p3 = por %p6051_p2, %p6050_p1 }
 0x157   : > { %v5589_v14 = vpop.f32.mrf.mxu1  ;;  %v5645_v12 = vpop.f32.mrf.mxu0  ;;  %5848 = vmatmul.mubr.msk.f32.gmra.mxu1 %vm302_vm1, %v4955_v26  ;;  %5904 = vmatmul.mubr.msk.f32.gmra.mxu0 %vm302_vm1, %v5028_v41 }
 0x158   : > { %v7189_v31 = vadd.f32 %v2124_v57, %v1848_v62  ;;  %v1851_v19 = vadd.f32 %v5589_v14, %v6946_v55  ;;  %5850 = vmatprep.mubr.msk.f32.mxu1 %vm302_vm1, %v4956_v60  ;;  %5906 = vmatprep.mubr.msk.f32.mxu0 %vm302_vm1, %v5029_v52  ;;  %p6046_p0 = pneg %p6045_p13 }
 0x159   : > { %v1703_v53 = vpop.f32.mrf.mxu1  ;;  %v2134_v28 = vpop.f32.mrf.mxu0 }
 0x15a   : > { %v7196_v0 = vadd.f32 %v5645_v12, %v1851_v19  ;;  %v1850_v50 = vadd.f32 %v1703_v53, %v6951_v56  ;;  %p6053_p5 = pnand %p6052_p3, %p6046_p0 }
 0x15b   : > { %v5592_v46 = vpop.f32.mrf.mxu1  ;;  %v5648_v7 = vpop.f32.mrf.mxu0  ;;  %5851 = vmatmul.mubr.msk.f32.gmra.mxu1 %vm302_vm1, %v4957_v38  ;;  %5907 = vmatmul.mubr.msk.f32.gmra.mxu0 %vm302_vm1, %v5030_v21 }
 0x15c   : > { %v7201_v20 = vadd.f32 %v2134_v28, %v1850_v50  ;;  %v1853_v55 = vadd.f32 %v5592_v46, %v6960_v51 }
 0x15d   : > { %v1713_v32 = vpop.f32.mrf.mxu1  ;;  %v2144_v25 = vpop.f32.mrf.mxu0 }
 0x15e   : > { %v7204_v44 = vadd.f32 %v5648_v7, %v1853_v55  ;;  %v1852_v36 = vadd.f32 %v1713_v32, %v6965_v24 }
 0x15f   : > { %v5595_v1 = vpop.f32.mrf.mxu1  ;;  %v5651_v43 = vpop.f32.mrf.mxu0 }
 0x160   : > { %v7207_v8 = vadd.f32 %v2144_v25, %v1852_v36  ;;  %v1855_v56 = vadd.f32 %v5595_v1, %v6974_v33 }
 0x161   : > { %v1723_v15 = vpop.f32.mrf.mxu1  ;;  %v2154_v13 = vpop.f32.mrf.mxu0 }
 0x162   : > { %v7210_v26 = vadd.f32 %v5651_v43, %v1855_v56  ;;  %v1854_v41 = vadd.f32 %v1723_v15, %v6979_v37 }
 0x163   : > { %v5598_v42 = vpop.f32.mrf.mxu1  ;;  %v5654_v51 = vpop.f32.mrf.mxu0 }
 0x164   : > { %v7213_v57 = vadd.f32 %v2154_v13, %v1854_v41  ;;  %v1857_v60 = vadd.f32 %v5598_v42, %v6988_v47 }
 0x165   : > { %v1733_v52 = vpop.f32.mrf.mxu1  ;;  %v2164_v24 = vpop.f32.mrf.mxu0 }
 0x166   : > { %v7216_v62 = vadd.f32 %v5654_v51, %v1857_v60  ;;  %v1856_v14 = vadd.f32 %v1733_v52, %v6993_v2 }
 0x167   : > { %v5601_v12 = vpop.f32.mrf.mxu1  ;;  %v5657_v33 = vpop.f32.mrf.mxu0 }
 0x168   : > { %v7219_v19 = vadd.f32 %v2164_v24, %v1856_v14  ;;  %v1859_v38 = vadd.f32 %v5601_v12, %v7002_v4 }
 0x169   : > { %v1743_v21 = vpop.f32.mrf.mxu1  ;;  %v2174_v37 = vpop.f32.mrf.mxu0 }
 0x16a   : > { %v7222_v53 = vadd.f32 %v5657_v33, %v1859_v38  ;;  %v1858_v28 = vadd.f32 %v1743_v21, %v7007_v29 }
 0x16b   : > { %v5604_v50 = vpop.f32.mrf.mxu1  ;;  %v5660_v47 = vpop.f32.mrf.mxu0 }
 0x16c   : > { %v7225_v46 = vadd.f32 %v2174_v37, %v1858_v28  ;;  %v1861_v7 = vadd.f32 %v5604_v50, %v7016_v10 }
 0x16d   : > { %v1753_v55 = vpop.f32.mrf.mxu1  ;;  %v2184_v2 = vpop.f32.mrf.mxu0 }
 0x16e   : > { %v7228_v32 = vadd.f32 %v5660_v47, %v1861_v7  ;;  %v1860_v25 = vadd.f32 %v1753_v55, %v7021_v48 }
 0x16f   : > { %v5607_v36 = vpop.f32.mrf.mxu1  ;;  %v5663_v4 = vpop.f32.mrf.mxu0 }
 0x170   : > { %v7231_v1 = vadd.f32 %v2184_v2, %v1860_v25  ;;  %v1863_v43 = vadd.f32 %v5607_v36, %v7030_v16 }
 0x171   : > { %v1763_v56 = vpop.f32.mrf.mxu1  ;;  %v2194_v29 = vpop.f32.mrf.mxu0 }
 0x172   : > { %v7234_v15 = vadd.f32 %v5663_v4, %v1863_v43  ;;  %v1862_v13 = vadd.f32 %v1763_v56, %v7035_v9 }
 0x173   : > { %v5610_v41 = vpop.f32.mrf.mxu1  ;;  %v5666_v10 = vpop.f32.mrf.mxu0 }
 0x174   : > { %v7237_v42 = vadd.f32 %v2194_v29, %v1862_v13  ;;  %v1865_v51 = vadd.f32 %v5610_v41, %v7044_v22 }
 0x175   : > { %v1773_v60 = vpop.f32.mrf.mxu1  ;;  %v2204_v48 = vpop.f32.mrf.mxu0 }
 0x176   : > { %v7240_v52 = vadd.f32 %v5666_v10, %v1865_v51  ;;  %v1864_v24 = vadd.f32 %v1773_v60, %v7049_v63 }
 0x177   : > { %v5613_v14 = vpop.f32.mrf.mxu1  ;;  %v5669_v16 = vpop.f32.mrf.mxu0 }
 0x178   : > { %v7243_v12 = vadd.f32 %v2204_v48, %v1864_v24  ;;  %v1867_v33 = vadd.f32 %v5613_v14, %v7058_v39 }
 0x179   : > { %v1783_v38 = vpop.f32.mrf.mxu1  ;;  %v2214_v9 = vpop.f32.mrf.mxu0 }
 0x17a   : > { %v7246_v21 = vadd.f32 %v5669_v16, %v1867_v33  ;;  %v1866_v37 = vadd.f32 %v1783_v38, %v7063_v61 }
 0x17b   : > { %v5616_v28 = vpop.f32.mrf.mxu1  ;;  %v5672_v22 = vpop.f32.mrf.mxu0 }
 0x17c   : > { %v7249_v50 = vadd.f32 %v2214_v9, %v1866_v37  ;;  %v1869_v47 = vadd.f32 %v5616_v28, %v7072_v45 }
 0x17d   : > { %v1793_v7 = vpop.f32.mrf.mxu1  ;;  %v2224_v63 = vpop.f32.mrf.mxu0 }
 0x17e   : > { %v7252_v55 = vadd.f32 %v5672_v22, %v1869_v47  ;;  %v1868_v2 = vadd.f32 %v1793_v7, %v7077_v18 }
 0x17f   : > { %v5619_v25 = vpop.f32.mrf.mxu1  ;;  %v5675_v39 = vpop.f32.mrf.mxu0 }
 0x180   : > { %v7255_v36 = vadd.f32 %v2224_v63, %v1868_v2  ;;  %v1871_v4 = vadd.f32 %v5619_v25, %v7086_v59 }
 0x181   : > { %v1803_v43 = vpop.f32.mrf.mxu1  ;;  %v2234_v61 = vpop.f32.mrf.mxu0 }
 0x182   : > { %v7258_v56 = vadd.f32 %v5675_v39, %v1871_v4  ;;  %v1870_v29 = vadd.f32 %v1803_v43, %v7091_v34 }
 0x183   : > { %v5622_v13 = vpop.f32.mrf.mxu1  ;;  %v5678_v45 = vpop.f32.mrf.mxu0 }
 0x184   : > { %v7261_v41 = vadd.f32 %v2234_v61, %v1870_v29  ;;  %v1873_v10 = vadd.f32 %v5622_v13, %v7100_v3 }
 0x185   : > { %v1813_v51 = vpop.f32.mrf.mxu1  ;;  %v2244_v18 = vpop.f32.mrf.mxu0 }
 0x186   : > { %v7264_v60 = vadd.f32 %v5678_v45, %v1873_v10  ;;  %v1872_v48 = vadd.f32 %v1813_v51, %v7105_v54 }
 0x187   : > { %v5625_v24 = vpop.f32.mrf.mxu1  ;;  %v5681_v59 = vpop.f32.mrf.mxu0 }
 0x188   : > { %v7267_v14 = vadd.f32 %v2244_v18, %v1872_v48  ;;  %v1875_v16 = vadd.f32 %v5625_v24, %v7114_v58 }
 0x189   : > { %v1823_v33 = vpop.f32.mrf.mxu1  ;;  %v2254_v34 = vpop.f32.mrf.mxu0 }
 0x18a   : > { %v7270_v38 = vadd.f32 %v5681_v59, %v1875_v16  ;;  %v1874_v9 = vadd.f32 %v1823_v33, %v7119_v27 }
 0x18b   : > { %v5628_v37 = vpop.f32.mrf.mxu1  ;;  %v5684_v3 = vpop.f32.mrf.mxu0 }
 0x18c   : > { %v7273_v28 = vadd.f32 %v2254_v34, %v1874_v9  ;;  %v1877_v22 = vadd.f32 %v5628_v37, %v7128_v5 }
 0x18d   : > { %v1833_v47 = vpop.f32.mrf.mxu1  ;;  %v2264_v54 = vpop.f32.mrf.mxu0 }
 0x18e   : > { %v7276_v7 = vadd.f32 %v5684_v3, %v1877_v22  ;;  %v1876_v63 = vadd.f32 %v1833_v47, %v7133_v40 }
 0x18f   : > { %v5689_v2 = vpop.f32.mrf.mxu1  ;;  %v5745_v58 = vpop.f32.mrf.mxu0 }
 0x190   : > { %v7279_v25 = vadd.f32 %v2264_v54, %v1876_v63  ;;  %v2705_v39 = vadd.f32 %v5689_v2, %v7142_v11 }
 0x191   : > { %v2525_v4 = vpop.f32.mrf.mxu1  ;;  %v2956_v27 = vpop.f32.mrf.mxu0 }
 0x192   : > { %v7282_v43 = vadd.f32 %v5745_v58, %v2705_v39  ;;  %v2704_v61 = vadd.f32 %v2525_v4, %v7147_v6 }
 0x193   : > { %v5692_v29 = vpop.f32.mrf.mxu1  ;;  %v5748_v5 = vpop.f32.mrf.mxu0 }
 0x194   : > { %v7285_v13 = vadd.f32 %v2956_v27, %v2704_v61  ;;  %v2707_v45 = vadd.f32 %v5692_v29, %v7156_v17 }
 0x195   : > { %v2535_v10 = vpop.f32.mrf.mxu1  ;;  %v2966_v40 = vpop.f32.mrf.mxu0 }
 0x196   : > { %v7288_v51 = vadd.f32 %v5748_v5, %v2707_v45  ;;  %v2706_v18 = vadd.f32 %v2535_v10, %v7161_v30 }
 0x197   : > { %v5695_v48 = vpop.f32.mrf.mxu1  ;;  %v5751_v11 = vpop.f32.mrf.mxu0 }
 0x198   : > { %v7291_v24 = vadd.f32 %v2966_v40, %v2706_v18  ;;  %v2709_v59 = vadd.f32 %v5695_v48, %v7170_v23 }
 0x199   : > { %v2545_v16 = vpop.f32.mrf.mxu1  ;;  %v2976_v6 = vpop.f32.mrf.mxu0 }
 0x19a   : > { %v7294_v33 = vadd.f32 %v5751_v11, %v2709_v59  ;;  %v2708_v34 = vadd.f32 %v2545_v16, %v7175_v49 }
 0x19b   : > { %v5698_v9 = vpop.f32.mrf.mxu1  ;;  %v5754_v17 = vpop.f32.mrf.mxu0 }
 0x19c   : > { %v7297_v37 = vadd.f32 %v2976_v6, %v2708_v34  ;;  %v2711_v3 = vadd.f32 %v5698_v9, %v7184_v35 }
 0x19d   : > { %v2555_v22 = vpop.f32.mrf.mxu1  ;;  %v2986_v30 = vpop.f32.mrf.mxu0 }
 0x19e   : > { %v7300_v47 = vadd.f32 %v5754_v17, %v2711_v3  ;;  %v2710_v54 = vadd.f32 %v2555_v22, %v7189_v31 }
 0x19f   : > { %v5701_v63 = vpop.f32.mrf.mxu1  ;;  %v5757_v23 = vpop.f32.mrf.mxu0 }
 0x1a0   : > { %v7303_v2 = vadd.f32 %v2986_v30, %v2710_v54  ;;  %v2713_v58 = vadd.f32 %v5701_v63, %v7196_v0 }
 0x1a1   : > { %v2565_v39 = vpop.f32.mrf.mxu1  ;;  %v2996_v49 = vpop.f32.mrf.mxu0 }
 0x1a2   : > { %v7306_v4 = vadd.f32 %v5757_v23, %v2713_v58  ;;  %v2712_v27 = vadd.f32 %v2565_v39, %v7201_v20 }
 0x1a3   : > { %v5704_v61 = vpop.f32.mrf.mxu1  ;;  %v5760_v35 = vpop.f32.mrf.mxu0 }
 0x1a4   : > { %v7309_v29 = vadd.f32 %v2996_v49, %v2712_v27  ;;  %v2715_v5 = vadd.f32 %v5704_v61, %v7204_v44 }
 0x1a5   : > { %v2575_v45 = vpop.f32.mrf.mxu1  ;;  %v3006_v31 = vpop.f32.mrf.mxu0 }
 0x1a6   : > { %v7312_v10 = vadd.f32 %v5760_v35, %v2715_v5  ;;  %v2714_v40 = vadd.f32 %v2575_v45, %v7207_v8 }
 0x1a7   : > { %v5707_v18 = vpop.f32.mrf.mxu1  ;;  %v5763_v0 = vpop.f32.mrf.mxu0 }
 0x1a8   : > { %v7315_v48 = vadd.f32 %v3006_v31, %v2714_v40  ;;  %v2717_v11 = vadd.f32 %v5707_v18, %v7210_v26 }
 0x1a9   : > { %v2585_v59 = vpop.f32.mrf.mxu1  ;;  %v3016_v20 = vpop.f32.mrf.mxu0 }
 0x1aa   : > { %v7318_v16 = vadd.f32 %v5763_v0, %v2717_v11  ;;  %v2716_v6 = vadd.f32 %v2585_v59, %v7213_v57 }
 0x1ab   : > { %v5710_v34 = vpop.f32.mrf.mxu1  ;;  %v5766_v44 = vpop.f32.mrf.mxu0 }
 0x1ac   : > { %v7321_v9 = vadd.f32 %v3016_v20, %v2716_v6  ;;  %v2719_v17 = vadd.f32 %v5710_v34, %v7216_v62 }
 0x1ad   : > { %v2595_v3 = vpop.f32.mrf.mxu1  ;;  %v3026_v8 = vpop.f32.mrf.mxu0 }
 0x1ae   : > { %v7324_v22 = vadd.f32 %v5766_v44, %v2719_v17  ;;  %v2718_v30 = vadd.f32 %v2595_v3, %v7219_v19 }
 0x1af   : > { %v5713_v54 = vpop.f32.mrf.mxu1  ;;  %v5769_v26 = vpop.f32.mrf.mxu0 }
 0x1b0   : > { %v7327_v63 = vadd.f32 %v3026_v8, %v2718_v30  ;;  %v2721_v23 = vadd.f32 %v5713_v54, %v7222_v53 }
 0x1b1   : > { %v2605_v58 = vpop.f32.mrf.mxu1  ;;  %v3036_v57 = vpop.f32.mrf.mxu0 }
 0x1b2   : > { %v7330_v39 = vadd.f32 %v5769_v26, %v2721_v23  ;;  %v2720_v49 = vadd.f32 %v2605_v58, %v7225_v46 }
 0x1b3   : > { %v5716_v27 = vpop.f32.mrf.mxu1  ;;  %v5772_v62 = vpop.f32.mrf.mxu0 }
 0x1b4   : > { %v7333_v61 = vadd.f32 %v3036_v57, %v2720_v49  ;;  %v2723_v35 = vadd.f32 %v5716_v27, %v7228_v32 }
 0x1b5   : > { %v2615_v5 = vpop.f32.mrf.mxu1  ;;  %v3046_v19 = vpop.f32.mrf.mxu0 }
 0x1b6   : > { %v7336_v45 = vadd.f32 %v5772_v62, %v2723_v35  ;;  %v2722_v31 = vadd.f32 %v2615_v5, %v7231_v1 }
 0x1b7   : > { %v5719_v40 = vpop.f32.mrf.mxu1  ;;  %v5775_v53 = vpop.f32.mrf.mxu0 }
 0x1b8   : > { %v7339_v18 = vadd.f32 %v3046_v19, %v2722_v31  ;;  %v2725_v0 = vadd.f32 %v5719_v40, %v7234_v15 }
 0x1b9   : > { %v2625_v11 = vpop.f32.mrf.mxu1  ;;  %v3056_v46 = vpop.f32.mrf.mxu0 }
 0x1ba   : > { %v7342_v59 = vadd.f32 %v5775_v53, %v2725_v0  ;;  %v2724_v20 = vadd.f32 %v2625_v11, %v7237_v42 }
 0x1bb   : > { %v5722_v6 = vpop.f32.mrf.mxu1  ;;  %v5778_v32 = vpop.f32.mrf.mxu0 }
 0x1bc   : > { %v7345_v34 = vadd.f32 %v3056_v46, %v2724_v20  ;;  %v2727_v44 = vadd.f32 %v5722_v6, %v7240_v52 }
 0x1bd   : > { %v2635_v17 = vpop.f32.mrf.mxu1  ;;  %v3066_v1 = vpop.f32.mrf.mxu0 }
 0x1be   : > { %v7348_v3 = vadd.f32 %v5778_v32, %v2727_v44  ;;  %v2726_v8 = vadd.f32 %v2635_v17, %v7243_v12 }
 0x1bf   : > { %v5725_v30 = vpop.f32.mrf.mxu1  ;;  %v5781_v15 = vpop.f32.mrf.mxu0 }
 0x1c0   : > { %v7351_v54 = vadd.f32 %v3066_v1, %v2726_v8  ;;  %v2729_v26 = vadd.f32 %v5725_v30, %v7246_v21 }
 0x1c1   : > { %v2645_v23 = vpop.f32.mrf.mxu1  ;;  %v3076_v42 = vpop.f32.mrf.mxu0 }
 0x1c2   : > { %v7354_v58 = vadd.f32 %v5781_v15, %v2729_v26  ;;  %v2728_v57 = vadd.f32 %v2645_v23, %v7249_v50 }
 0x1c3   : > { %v5728_v49 = vpop.f32.mrf.mxu1  ;;  %v5784_v52 = vpop.f32.mrf.mxu0 }
 0x1c4   : > { %v7357_v27 = vadd.f32 %v3076_v42, %v2728_v57  ;;  %v2731_v62 = vadd.f32 %v5728_v49, %v7252_v55 }
 0x1c5   : > { %v2655_v35 = vpop.f32.mrf.mxu1  ;;  %v3086_v12 = vpop.f32.mrf.mxu0 }
 0x1c6   : > { %v7360_v5 = vadd.f32 %v5784_v52, %v2731_v62  ;;  %v2730_v19 = vadd.f32 %v2655_v35, %v7255_v36 }
 0x1c7   : > { %v5731_v31 = vpop.f32.mrf.mxu1  ;;  %v5787_v21 = vpop.f32.mrf.mxu0 }
 0x1c8   : > { %v7363_v40 = vadd.f32 %v3086_v12, %v2730_v19  ;;  %v2733_v53 = vadd.f32 %v5731_v31, %v7258_v56 }
 0x1c9   : > { %v2665_v0 = vpop.f32.mrf.mxu1  ;;  %v3096_v50 = vpop.f32.mrf.mxu0 }
 0x1ca   : > { %v7366_v11 = vadd.f32 %v5787_v21, %v2733_v53  ;;  %v2732_v46 = vadd.f32 %v2665_v0, %v7261_v41 }
 0x1cb   : > { %v5734_v20 = vpop.f32.mrf.mxu1  ;;  %v5790_v55 = vpop.f32.mrf.mxu0 }
 0x1cc   : > { %v7369_v6 = vadd.f32 %v3096_v50, %v2732_v46  ;;  %v2735_v32 = vadd.f32 %v5734_v20, %v7264_v60 }
 0x1cd   : > { %v2675_v44 = vpop.f32.mrf.mxu1  ;;  %v3106_v36 = vpop.f32.mrf.mxu0 }
 0x1ce   : > { %v7372_v17 = vadd.f32 %v5790_v55, %v2735_v32  ;;  %v2734_v1 = vadd.f32 %v2675_v44, %v7267_v14 }
 0x1cf   : > { %v5737_v8 = vpop.f32.mrf.mxu1  ;;  %v5793_v56 = vpop.f32.mrf.mxu0 }
 0x1d0   : > { %v7375_v30 = vadd.f32 %v3106_v36, %v2734_v1  ;;  %v2737_v15 = vadd.f32 %v5737_v8, %v7270_v38 }
 0x1d1   : > { %v2685_v26 = vpop.f32.mrf.mxu1  ;;  %v3116_v41 = vpop.f32.mrf.mxu0 }
 0x1d2   : > { %v7378_v23 = vadd.f32 %v5793_v56, %v2737_v15  ;;  %v2736_v42 = vadd.f32 %v2685_v26, %v7273_v28  ;;  %v7393_v28 = vld [vmem:[%s7704_s2] ss:$0 sm:$0xff] }
 0x1d3   : > { %v5740_v57 = vpop.f32.mrf.mxu1  ;;  %v5796_v60 = vpop.f32.mrf.mxu0 }
 0x1d4   : > { %v7381_v49 = vadd.f32 %v3116_v41, %v2736_v42  ;;  %v2739_v52 = vadd.f32 %v5740_v57, %v7276_v7 }
 0x1d5   : > { %v2695_v62 = vpop.f32.mrf.mxu1  ;;  %v3126_v14 = vpop.f32.mrf.mxu0 }
 0x1d6   : > { %v7384_v35 = vadd.f32 %v5796_v60, %v2739_v52  ;;  %v2738_v12 = vadd.f32 %v2695_v62, %v7279_v25 }
 0x1d7   : > { %v5801_v19 = vpop.f32.mrf.mxu1  ;;  %v5857_v38 = vpop.f32.mrf.mxu0 }
 0x1d8   : > { %v7387_v31 = vadd.f32 %v3126_v14, %v2738_v12  ;;  %v3567_v21 = vadd.f32 %v5801_v19, %v7282_v43 }
 0x1d9   : > { %v3387_v53 = vpop.f32.mrf.mxu1  ;;  %v3818_v0 = vpop.f32.mrf.mxu0 }
 0x1da   : > { %v3998_v7 = vadd.f32 %v5857_v38, %v3567_v21  ;;  %v3566_v50 = vadd.f32 %v3387_v53, %v7285_v13 }
 0x1db   : > { %v5804_v46 = vpop.f32.mrf.mxu1  ;;  %v5860_v20 = vpop.f32.mrf.mxu0 }
 0x1dc   : > { %v7397_v25 = vadd.f32 %v7393_v28, %v3998_v7  ;;  %v3997_v55 = vadd.f32 %v3818_v0, %v3566_v50  ;;  %v3569_v32 = vadd.f32 %v5804_v46, %v7288_v51 }
 0x1dd   : > { %v3397_v44 = vpop.f32.mrf.mxu1  ;;  %v3828_v43 = vpop.f32.mrf.mxu0 }
 0x1de   : > { %v4077_v36 = vmul.f32 0.5, %v7397_v25  ;;  %v7402_v1 = vadd.f32 %v7393_v28, %v3997_v55  ;;  %v4000_v8 = vadd.f32 %v5860_v20, %v3569_v32  ;;  %v3568_v56 = vadd.f32 %v3397_v44, %v7291_v24 }
 0x1df   : > { %v5807_v15 = vpop.f32.mrf.mxu1  ;;  %v5863_v13 = vpop.f32.mrf.mxu0 }
 0x1e0   : > { %5971 = vtanh.f32 %v4077_v36  ;;  %v4076_v26 = vmul.f32 0.5, %v7402_v1  ;;  %v7407_v41 = vadd.f32 %v7393_v28, %v4000_v8  ;;  %v3999_v42 = vadd.f32 %v3828_v43, %v3568_v56 }
 0x1e1   : > { %v3571_v51 = vadd.f32 %v5807_v15, %v7294_v33  ;;  %v3407_v57 = vpop.f32.mrf.mxu1  ;;  %v3838_v60 = vpop.f32.mrf.mxu0 }
 0x1e2   : > { %5973 = vtanh.f32 %v4076_v26  ;;  %v4079_v52 = vmul.f32 0.5, %v7407_v41  ;;  %v7412_v62 = vadd.f32 %v7393_v28, %v3999_v42  ;;  %v3570_v24 = vadd.f32 %v3407_v57, %v7297_v37 }
 0x1e3   : > { %v4002_v14 = vadd.f32 %v5863_v13, %v3571_v51  ;;  %v5810_v12 = vpop.f32.mrf.mxu1  ;;  %v5866_v19 = vpop.f32.mrf.mxu0 }
 0x1e4   : > { %5975 = vtanh.f32 %v4079_v52  ;;  %v4078_v38 = vmul.f32 0.5, %v7412_v62  ;;  %v4001_v21 = vadd.f32 %v3838_v60, %v3570_v24  ;;  %v3573_v53 = vadd.f32 %v5810_v12, %v7300_v47 }
 0x1e5   : > { %v7418_v33 = vadd.f32 %v7393_v28, %v4002_v14  ;;  %v3417_v0 = vpop.f32.mrf.mxu1  ;;  %v3848_v7 = vpop.f32.mrf.mxu0 }
 0x1e6   : > { %5977 = vtanh.f32 %v4078_v38  ;;  %v7421_v50 = vadd.f32 %v7393_v28, %v4001_v21  ;;  %v4004_v37 = vadd.f32 %v5866_v19, %v3573_v53  ;;  %v3572_v46 = vadd.f32 %v3417_v0, %v7303_v2 }
 0x1e7   : > { %v4081_v20 = vmul.f32 0.5, %v7418_v33  ;;  %v5813_v55 = vpop.f32.mrf.mxu1  ;;  %v5869_v32 = vpop.f32.mrf.mxu0 }
 0x1e8   : > { %v4080_v44 = vmul.f32 0.5, %v7421_v50  ;;  %v7427_v47 = vadd.f32 %v7393_v28, %v4004_v37  ;;  %v4003_v43 = vadd.f32 %v3848_v7, %v3572_v46  ;;  %v3575_v36 = vadd.f32 %v5813_v55, %v7306_v4 }
 0x1e9   : > { %5979 = vtanh.f32 %v4081_v20  ;;  %v3427_v8 = vpop.f32.mrf.mxu1  ;;  %v3858_v56 = vpop.f32.mrf.mxu0 }
 0x1ea   : > { %5981 = vtanh.f32 %v4080_v44  ;;  %v4083_v2 = vmul.f32 0.5, %v7427_v47  ;;  %v7433_v15 = vadd.f32 %v7393_v28, %v4003_v43  ;;  %v4006_v13 = vadd.f32 %v5869_v32, %v3575_v36 }
 0x1eb   : > { %v3574_v26 = vadd.f32 %v3427_v8, %v7309_v29  ;;  %v5816_v42 = vpop.f32.mrf.mxu1  ;;  %v5872_v51 = vpop.f32.mrf.mxu0 }
 0x1ec   : > { %5983 = vtanh.f32 %v4083_v2  ;;  %v4082_v57 = vmul.f32 0.5, %v7433_v15  ;;  %v7438_v4 = vadd.f32 %v7393_v28, %v4006_v13  ;;  %v3577_v60 = vadd.f32 %v5816_v42, %v7312_v10 }
 0x1ed   : > { %v5972_v52 = vpop.eup %5971  ;;  %v4005_v24 = vadd.f32 %v3858_v56, %v3574_v26  ;;  %v3437_v14 = vpop.f32.mrf.mxu1 }
 0x1ee   : > { %v3868_v12 = vpop.f32.mrf.mxu0  ;;  %v4149_v19 = vadd.f32 1.0, %v5972_v52  ;;  %5985 = vtanh.f32 %v4082_v57  ;;  %v4085_v29 = vmul.f32 0.5, %v7438_v4  ;;  %v4008_v38 = vadd.f32 %v5872_v51, %v3577_v60 }
 0x1ef   : > { %v5974_v21 = vpop.eup %5973  ;;  %v7447_v53 = vadd.f32 %v7393_v28, %v4005_v24  ;;  %v3576_v0 = vadd.f32 %v3437_v14, %v7315_v48  ;;  %v5819_v7 = vpop.f32.mrf.mxu1 }
 0x1f0   : > { %v5875_v10 = vpop.f32.mrf.mxu0  ;;  %v4185_v37 = vmul.f32 0.5, %v4149_v19  ;;  %v4148_v46 = vadd.f32 1.0, %v5974_v21  ;;  %5987 = vtanh.f32 %v4085_v29  ;;  %v7451_v20 = vadd.f32 %v7393_v28, %v4008_v38 }
 0x1f1   : > { %v5976_v55 = vpop.eup %5975  ;;  %v4084_v32 = vmul.f32 0.5, %v7447_v53  ;;  %v4007_v44 = vadd.f32 %v3868_v12, %v3576_v0  ;;  %v3579_v43 = vadd.f32 %v5819_v7, %v7318_v16  ;;  %v3447_v36 = vpop.f32.mrf.mxu1 }
 0x1f2   : > { %v3878_v8 = vpop.f32.mrf.mxu0  ;;  %v4221_v56 = vmul.f32 %v4185_v37, %v7397_v25  ;;  %v4184_v48 = vmul.f32 0.5, %v4148_v46  ;;  %v4151_v2 = vadd.f32 1.0, %v5976_v55  ;;  %v4087_v13 = vmul.f32 0.5, %v7451_v20 }
 0x1f3   : > { %v5978_v26 = vpop.eup %5977  ;;  %5989 = vtanh.f32 %v4084_v32  ;;  %v7458_v42 = vadd.f32 %v7393_v28, %v4007_v44  ;;  %v4010_v51 = vadd.f32 %v5875_v10, %v3579_v43  ;;  %v3578_v57 = vadd.f32 %v3447_v36, %v7321_v9  ;;  %v5822_v60 = vpop.f32.mrf.mxu1 }
 0x1f4   : > { %v5878_v52 = vpop.f32.mrf.mxu0  ;;  %4257 = vst [vmem:[%s7462_s9 + $0x8] sm:$0xff] %v4221_v56  ;;  %v4220_v16 = vmul.f32 %v4184_v48, %v7402_v1  ;;  %v4187_v25 = vmul.f32 0.5, %v4151_v2  ;;  %v4150_v24 = vadd.f32 1.0, %v5978_v26  ;;  %5991 = vtanh.f32 %v4087_v13 }
 0x1f5   : > { %v4086_v14 = vmul.f32 0.5, %v7458_v42  ;;  %v7468_v12 = vadd.f32 %v7393_v28, %v4010_v51  ;;  %v4009_v19 = vadd.f32 %v3878_v8, %v3578_v57  ;;  %v3581_v9 = vadd.f32 %v5822_v60, %v7324_v22  ;;  %v3457_v29 = vpop.f32.mrf.mxu1 }
 0x1f6   : > { %v3888_v38 = vpop.f32.mrf.mxu0  ;;  %v5980_v21 = vpop.eup %5979  ;;  %4256 = vst [vmem:[%s7462_s9] sm:$0xff] %v4220_v16  ;;  %v4223_v0 = vmul.f32 %v4187_v25, %v7407_v41  ;;  %v4186_v7 = vmul.f32 0.5, %v4150_v24  ;;  %v3580_v1 = vadd.f32 %v3457_v29, %v7327_v63 }
 0x1f7   : > { %v5982_v10 = vpop.eup %5981  ;;  %v4153_v37 = vadd.f32 1.0, %v5980_v21  ;;  %5993 = vtanh.f32 %v4086_v14  ;;  %v4089_v46 = vmul.f32 0.5, %v7468_v12  ;;  %v7476_v55 = vadd.f32 %v7393_v28, %v4009_v19  ;;  %v5825_v32 = vpop.f32.mrf.mxu1 }
 0x1f8   : > { %v5881_v22 = vpop.f32.mrf.mxu0  ;;  %4259 = vst [vmem:[%s7462_s9 + $0x18] sm:$0xff] %v4223_v0  ;;  %v4222_v44 = vmul.f32 %v4186_v7, %v7412_v62  ;;  %v4152_v43 = vadd.f32 1.0, %v5982_v10  ;;  %v4012_v36 = vadd.f32 %v5878_v52, %v3581_v9  ;;  %v4011_v41 = vadd.f32 %v3888_v38, %v3580_v1 }
 0x1f9   : > { %v5984_v8 = vpop.eup %5983  ;;  %v4189_v56 = vmul.f32 0.5, %v4153_v37  ;;  %5995 = vtanh.f32 %v4089_v46  ;;  %v4088_v63 = vmul.f32 0.5, %v7476_v55  ;;  %v3583_v48 = vadd.f32 %v5825_v32, %v7330_v39  ;;  %v3467_v2 = vpop.f32.mrf.mxu1 }
 0x1fa   : > { %v3898_v13 = vpop.f32.mrf.mxu0  ;;  %4258 = vst [vmem:[%s7462_s9 + $0x10] sm:$0xff] %v4222_v44  ;;  %v4188_v26 = vmul.f32 0.5, %v4152_v43  ;;  %v4155_v51 = vadd.f32 1.0, %v5984_v8  ;;  %v7484_v57 = vadd.f32 %v7393_v28, %v4012_v36  ;;  %v7487_v62 = vadd.f32 %v7393_v28, %v4011_v41 }
 0x1fb   : > { %v5986_v60 = vpop.eup %5985  ;;  %v4225_v52 = vmul.f32 %v4189_v56, %v7418_v33  ;;  %5997 = vtanh.f32 %v4088_v63  ;;  %v4014_v16 = vadd.f32 %v5881_v22, %v3583_v48  ;;  %v3582_v39 = vadd.f32 %v3467_v2, %v7333_v61  ;;  %v5828_v25 = vpop.f32.mrf.mxu1 }
 0x1fc   : > { %v5884_v24 = vpop.f32.mrf.mxu0  ;;  %v4224_v14 = vmul.f32 %v4188_v26, %v7421_v50  ;;  %v4191_v19 = vmul.f32 0.5, %v4155_v51  ;;  %v4154_v9 = vadd.f32 1.0, %v5986_v60  ;;  %v4091_v29 = vmul.f32 0.5, %v7484_v57 }
 0x1fd   : > { %v5988_v38 = vpop.eup %5987  ;;  %4261 = vst [vmem:[%s7462_s9 + $0x28] sm:$0xff] %v4225_v52  ;;  %v4090_v21 = vmul.f32 0.5, %v7487_v62  ;;  %v7496_v0 = vadd.f32 %v7393_v28, %v4014_v16  ;;  %v4013_v33 = vadd.f32 %v3898_v13, %v3582_v39  ;;  %v3585_v7 = vadd.f32 %v5828_v25, %v7336_v45  ;;  %v3477_v61 = vpop.f32.mrf.mxu1 }
 0x1fe   : > { %v3908_v1 = vpop.f32.mrf.mxu0  ;;  %4260 = vst [vmem:[%s7462_s9 + $0x20] sm:$0xff] %v4224_v14  ;;  %v4227_v50 = vmul.f32 %v4191_v19, %v7427_v47  ;;  %v4190_v10 = vmul.f32 0.5, %v4154_v9  ;;  %v4157_v37 = vadd.f32 1.0, %v5988_v38  ;;  %5999 = vtanh.f32 %v4091_v29 }
 0x1ff   : > { %6001 = vtanh.f32 %v4090_v21  ;;  %v4093_v46 = vmul.f32 0.5, %v7496_v0  ;;  %v7503_v32 = vadd.f32 %v7393_v28, %v4013_v33  ;;  %v4016_v22 = vadd.f32 %v5884_v24, %v3585_v7  ;;  %v5831_v44 = vpop.f32.mrf.mxu1 }
 0x200   : > { %v5887_v43 = vpop.f32.mrf.mxu0  ;;  %v5990_v36 = vpop.eup %5989  ;;  %4263 = vst [vmem:[%s7462_s9 + $0x38] sm:$0xff] %v4227_v50  ;;  %v4226_v45 = vmul.f32 %v4190_v10, %v7433_v15  ;;  %v4193_v41 = vmul.f32 0.5, %v4157_v37  ;;  %v3584_v47 = vadd.f32 %v3477_v61, %v7339_v18  ;;  %v3587_v8 = vadd.f32 %v5831_v44, %v7342_v59 }
 0x201   : > { %v5992_v56 = vpop.eup %5991  ;;  %v4156_v63 = vadd.f32 1.0, %v5990_v36  ;;  %6003 = vtanh.f32 %v4093_v46  ;;  %v4092_v48 = vmul.f32 0.5, %v7503_v32  ;;  %v7511_v2 = vadd.f32 %v7393_v28, %v4016_v22  ;;  %v3487_v13 = vpop.f32.mrf.mxu1 }
 0x202   : > { %v3918_v26 = vpop.f32.mrf.mxu0  ;;  %4262 = vst [vmem:[%s7462_s9 + $0x30] sm:$0xff] %v4226_v45  ;;  %v4229_v51 = vmul.f32 %v4193_v41, %v7438_v4  ;;  %v4159_v15 = vadd.f32 1.0, %v5992_v56  ;;  %v4015_v60 = vadd.f32 %v3908_v1, %v3584_v47  ;;  %v4018_v52 = vadd.f32 %v5887_v43, %v3587_v8 }
 0x203   : > { %v4192_v18 = vmul.f32 0.5, %v4156_v63  ;;  %6005 = vtanh.f32 %v4092_v48  ;;  %v4095_v59 = vmul.f32 0.5, %v7511_v2  ;;  %v3586_v16 = vadd.f32 %v3487_v13, %v7345_v34  ;;  %v5834_v39 = vpop.f32.mrf.mxu1 }
 0x204   : > { %v5890_v25 = vpop.f32.mrf.mxu0  ;;  %v5994_v24 = vpop.eup %5993  ;;  %4265 = vst [vmem:[%s7462_s9 + $0x48] sm:$0xff] %v4229_v51  ;;  %v4195_v14 = vmul.f32 0.5, %v4159_v15  ;;  %v7519_v19 = vadd.f32 %v7393_v28, %v4015_v60  ;;  %v7522_v4 = vadd.f32 %v7393_v28, %v4018_v52  ;;  %v3589_v9 = vadd.f32 %v5834_v39, %v7348_v3 }
 0x205   : > { %v4228_v29 = vmul.f32 %v4192_v18, %v7447_v53  ;;  %v4158_v38 = vadd.f32 1.0, %v5994_v24  ;;  %6007 = vtanh.f32 %v4095_v59  ;;  %v4017_v21 = vadd.f32 %v3918_v26, %v3586_v16  ;;  %v3497_v34 = vpop.f32.mrf.mxu1 }
 0x206   : > { %v3928_v33 = vpop.f32.mrf.mxu0  ;;  %v5996_v7 = vpop.eup %5995  ;;  %v4231_v61 = vmul.f32 %v4195_v14, %v7451_v20  ;;  %v4094_v1 = vmul.f32 0.5, %v7519_v19  ;;  %v4097_v50 = vmul.f32 0.5, %v7522_v4  ;;  %v4020_v10 = vadd.f32 %v5890_v25, %v3589_v9 }
 0x207   : > { %4264 = vst [vmem:[%s7462_s9 + $0x40] sm:$0xff] %v4228_v29  ;;  %v4194_v37 = vmul.f32 0.5, %v4158_v38  ;;  %v4161_v46 = vadd.f32 1.0, %v5996_v7  ;;  %v7531_v3 = vadd.f32 %v7393_v28, %v4017_v21  ;;  %v3588_v53 = vadd.f32 %v3497_v34, %v7351_v54  ;;  %v5837_v22 = vpop.f32.mrf.mxu1 }
 0x208   : > { %v5893_v44 = vpop.f32.mrf.mxu0  ;;  %v5998_v43 = vpop.eup %5997  ;;  %4267 = vst [vmem:[%s7462_s9 + $0x58] sm:$0xff] %v4231_v61  ;;  %6009 = vtanh.f32 %v4094_v1  ;;  %v7536_v20 = vadd.f32 %v7393_v28, %v4020_v10  ;;  %v3591_v36 = vadd.f32 %v5837_v22, %v7354_v58 }
 0x209   : > { %v4230_v45 = vmul.f32 %v4194_v37, %v7458_v42  ;;  %v4197_v41 = vmul.f32 0.5, %v4161_v46  ;;  %v4160_v47 = vadd.f32 1.0, %v5998_v43  ;;  %6011 = vtanh.f32 %v4097_v50  ;;  %v3507_v8 = vpop.f32.mrf.mxu1 }
 0x20a   : > { %v3938_v56 = vpop.f32.mrf.mxu0  ;;  %v4096_v54 = vmul.f32 0.5, %v7531_v3  ;;  %v4099_v63 = vmul.f32 0.5, %v7536_v20  ;;  %v4019_v48 = vadd.f32 %v3928_v33, %v3588_v53  ;;  %v4022_v13 = vadd.f32 %v5893_v44, %v3591_v36 }
 0x20b   : > { %v6000_v26 = vpop.eup %5999  ;;  %4266 = vst [vmem:[%s7462_s9 + $0x50] sm:$0xff] %v4230_v45  ;;  %v4233_v51 = vmul.f32 %v4197_v41, %v7468_v12  ;;  %v4196_v15 = vmul.f32 0.5, %v4160_v47  ;;  %v3590_v58 = vadd.f32 %v3507_v8, %v7357_v27  ;;  %v5840_v42 = vpop.f32.mrf.mxu1 }
 0x20c   : > { %v5896_v60 = vpop.f32.mrf.mxu0  ;;  %v6002_v52 = vpop.eup %6001  ;;  %v4163_v18 = vadd.f32 1.0, %v6000_v26  ;;  %6013 = vtanh.f32 %v4096_v54  ;;  %v7546_v59 = vadd.f32 %v7393_v28, %v4019_v48  ;;  %v7549_v16 = vadd.f32 %v7393_v28, %v4022_v13 }
 0x20d   : > { %4269 = vst [vmem:[%s7462_s9 + $0x68] sm:$0xff] %v4233_v51  ;;  %v4232_v39 = vmul.f32 %v4196_v15, %v7476_v55  ;;  %v4162_v25 = vadd.f32 1.0, %v6002_v52  ;;  %6015 = vtanh.f32 %v4099_v63  ;;  %v4021_v12 = vadd.f32 %v3938_v56, %v3590_v58  ;;  %v3517_v24 = vpop.f32.mrf.mxu1 }
 0x20e   : > { %v3948_v27 = vpop.f32.mrf.mxu0  ;;  %v6004_v14 = vpop.eup %6003  ;;  %v4199_v9 = vmul.f32 0.5, %v4163_v18  ;;  %v4098_v29 = vmul.f32 0.5, %v7546_v59  ;;  %v4101_v38 = vmul.f32 0.5, %v7549_v16  ;;  %v3593_v21 = vadd.f32 %v5840_v42, %v7360_v5 }
 0x20f   : > { %4268 = vst [vmem:[%s7462_s9 + $0x60] sm:$0xff] %v4232_v39  ;;  %v4198_v34 = vmul.f32 0.5, %v4162_v25  ;;  %v4165_v33 = vadd.f32 1.0, %v6004_v14  ;;  %v7558_v7 = vadd.f32 %v7393_v28, %v4021_v12  ;;  %v3592_v55 = vadd.f32 %v3517_v24, %v7363_v40  ;;  %v5843_v61 = vpop.f32.mrf.mxu1 }
 0x210   : > { %v5899_v1 = vpop.f32.mrf.mxu0  ;;  %v6006_v50 = vpop.eup %6005  ;;  %v4235_v10 = vmul.f32 %v4199_v9, %v7484_v57  ;;  %6017 = vtanh.f32 %v4098_v29  ;;  %v4024_v37 = vadd.f32 %v5896_v60, %v3593_v21  ;;  %v3595_v46 = vadd.f32 %v5843_v61, %v7366_v11 }
 0x211   : > { %v4234_v5 = vmul.f32 %v4198_v34, %v7487_v62  ;;  %v4201_v53 = vmul.f32 0.5, %v4165_v33  ;;  %v4164_v22 = vadd.f32 1.0, %v6006_v50  ;;  %6019 = vtanh.f32 %v4101_v38  ;;  %v3527_v44 = vpop.f32.mrf.mxu1 }
 0x212   : > { %v3958_v43 = vpop.f32.mrf.mxu0  ;;  %v6008_v36 = vpop.eup %6007  ;;  %4271 = vst [vmem:[%s7462_s9 + $0x78] sm:$0xff] %v4235_v10  ;;  %v4100_v40 = vmul.f32 0.5, %v7558_v7  ;;  %v7567_v45 = vadd.f32 %v7393_v28, %v4024_v37  ;;  %v4023_v57 = vadd.f32 %v3948_v27, %v3592_v55  ;;  %v4026_v41 = vadd.f32 %v5899_v1, %v3595_v46 }
 0x213   : > { %4270 = vst [vmem:[%s7462_s9 + $0x70] sm:$0xff] %v4234_v5  ;;  %v4237_v11 = vmul.f32 %v4201_v53, %v7496_v0  ;;  %v4200_v47 = vmul.f32 0.5, %v4164_v22  ;;  %v4167_v62 = vadd.f32 1.0, %v6008_v36  ;;  %v3594_v8 = vadd.f32 %v3527_v44, %v7369_v6  ;;  %v5846_v56 = vpop.f32.mrf.mxu1 }
 0x214   : > { %v5902_v54 = vpop.f32.mrf.mxu0  ;;  %6021 = vtanh.f32 %v4100_v40  ;;  %v4103_v63 = vmul.f32 0.5, %v7567_v45  ;;  %v7574_v48 = vadd.f32 %v7393_v28, %v4023_v57  ;;  %v7577_v13 = vadd.f32 %v7393_v28, %v4026_v41 }
 0x215   : > { %v6010_v26 = vpop.eup %6009  ;;  %4273 = vst [vmem:[%s7462_s9 + $0x88] sm:$0xff] %v4237_v11  ;;  %v4236_v0 = vmul.f32 %v4200_v47, %v7503_v32  ;;  %v4203_v51 = vmul.f32 0.5, %v4167_v62  ;;  %v4025_v15 = vadd.f32 %v3958_v43, %v3594_v8  ;;  %v3597_v6 = vadd.f32 %v5846_v56, %v7372_v17  ;;  %v3537_v58 = vpop.f32.mrf.mxu1 }
 0x216   : > { %v3968_v42 = vpop.f32.mrf.mxu0  ;;  %v6012_v60 = vpop.eup %6011  ;;  %v4166_v52 = vadd.f32 1.0, %v6010_v26  ;;  %6023 = vtanh.f32 %v4103_v63  ;;  %v4102_v18 = vmul.f32 0.5, %v7574_v48  ;;  %v4105_v39 = vmul.f32 0.5, %v7577_v13 }
 0x217   : > { %4272 = vst [vmem:[%s7462_s9 + $0x80] sm:$0xff] %v4236_v0  ;;  %v4239_v25 = vmul.f32 %v4203_v51, %v7511_v2  ;;  %v4169_v12 = vadd.f32 1.0, %v6012_v60  ;;  %v7587_v32 = vadd.f32 %v7393_v28, %v4025_v15  ;;  %v4028_v24 = vadd.f32 %v5902_v54, %v3597_v6  ;;  %v5849_v27 = vpop.f32.mrf.mxu1 }
 0x218   : > { %v5905_v17 = vpop.f32.mrf.mxu0  ;;  %v4202_v14 = vmul.f32 0.5, %v4166_v52  ;;  %6025 = vtanh.f32 %v4102_v18  ;;  %v3596_v9 = vadd.f32 %v3537_v58, %v7375_v30  ;;  %v3599_v29 = vadd.f32 %v5849_v27, %v7378_v23 }
 0x219   : > { %v6014_v38 = vpop.eup %6013  ;;  %4275 = vst [vmem:[%s7462_s9 + $0x98] sm:$0xff] %v4239_v25  ;;  %v4205_v21 = vmul.f32 0.5, %v4169_v12  ;;  %6027 = vtanh.f32 %v4105_v39  ;;  %v4104_v2 = vmul.f32 0.5, %v7587_v32  ;;  %v7594_v34 = vadd.f32 %v7393_v28, %v4028_v24  ;;  %v3547_v33 = vpop.f32.mrf.mxu1 }
 0x21a   : > { %v3978_v55 = vpop.f32.mrf.mxu0  ;;  %v6016_v61 = vpop.eup %6015  ;;  %v4238_v1 = vmul.f32 %v4202_v14, %v7519_v19  ;;  %v4168_v50 = vadd.f32 1.0, %v6014_v38  ;;  %v4027_v30 = vadd.f32 %v3968_v42, %v3596_v9  ;;  %v4030_v10 = vadd.f32 %v5905_v17, %v3599_v29 }
 0x21b   : > { %v4241_v23 = vmul.f32 %v4205_v21, %v7522_v4  ;;  %v4171_v37 = vadd.f32 1.0, %v6016_v61  ;;  %6029 = vtanh.f32 %v4104_v2  ;;  %v4107_v46 = vmul.f32 0.5, %v7594_v34  ;;  %v5852_v5 = vpop.f32.mrf.mxu1 }
 0x21c   : > { %4274 = vst [vmem:[%s7462_s9 + $0x90] sm:$0xff] %v4238_v1  ;;  %v4204_v53 = vmul.f32 0.5, %v4168_v50  ;;  %v7601_v22 = vadd.f32 %v7393_v28, %v4027_v30  ;;  %v7604_v44 = vadd.f32 %v7393_v28, %v4030_v10  ;;  %v3598_v19 = vadd.f32 %v3547_v33, %v7381_v49  ;;  %v5908_v40 = vpop.f32.mrf.mxu0 }
 0x21d   : > { %v6018_v43 = vpop.eup %6017  ;;  %4277 = vst [vmem:[%s7462_s9 + $0xa8] sm:$0xff] %v4241_v23  ;;  %v4207_v36 = vmul.f32 0.5, %v4171_v37  ;;  %6031 = vtanh.f32 %v4107_v46  ;;  %v3601_v4 = vadd.f32 %v5852_v5, %v7384_v35  ;;  %v3557_v57 = vpop.f32.mrf.mxu1 }
 0x21e   : > { %v6020_v41 = vpop.eup %6019  ;;  %v4240_v11 = vmul.f32 %v4204_v53, %v7531_v3  ;;  %v4170_v47 = vadd.f32 1.0, %v6018_v43  ;;  %v4106_v62 = vmul.f32 0.5, %v7601_v22  ;;  %v4109_v8 = vmul.f32 0.5, %v7604_v44 }
 0x21f   : > { %v4243_v49 = vmul.f32 %v4207_v36, %v7536_v20  ;;  %v4173_v56 = vadd.f32 1.0, %v6020_v41  ;;  %v4029_v54 = vadd.f32 %v3978_v55, %v3598_v19  ;;  %v4032_v63 = vadd.f32 %v5908_v40, %v3601_v4  ;;  %v3988_v20 = vpop.f32.mrf.mxu0 }
 0x220   : > { %4276 = vst [vmem:[%s7462_s9 + $0xa0] sm:$0xff] %v4240_v11  ;;  %v4206_v26 = vmul.f32 0.5, %v4170_v47  ;;  %6033 = vtanh.f32 %v4106_v62  ;;  %v3600_v35 = vadd.f32 %v3557_v57, %v7387_v31 }
 0x221   : > { %v6022_v0 = vpop.eup %6021  ;;  %4279 = vst [vmem:[%s7462_s9 + $0xb8] sm:$0xff] %v4243_v49  ;;  %v4209_v51 = vmul.f32 0.5, %v4173_v56  ;;  %6035 = vtanh.f32 %v4109_v8  ;;  %v4072_v3 = vadd.f32 %v7393_v28, %v4029_v54  ;;  %v7618_v15 = vadd.f32 %v7393_v28, %v4032_v63 }
 0x222   : > { %v4242_v6 = vmul.f32 %v4206_v26, %v7546_v59  ;;  %v4172_v58 = vadd.f32 1.0, %v6022_v0  ;;  %v4031_v42 = vadd.f32 %v3988_v20, %v3600_v35 }
 0x223   : > { %v6024_v60 = vpop.eup %6023  ;;  %v4245_v52 = vmul.f32 %v4209_v51, %v7549_v16  ;;  %v4108_v18 = vmul.f32 0.5, %v4072_v3  ;;  %v4111_v31 = vmul.f32 0.5, %v7618_v15 }
 0x224   : > { %4278 = vst [vmem:[%s7462_s9 + $0xb0] sm:$0xff] %v4242_v6  ;;  %v4208_v39 = vmul.f32 0.5, %v4172_v58  ;;  %v4175_v25 = vadd.f32 1.0, %v6024_v60  ;;  %v4074_v12 = vadd.f32 %v7393_v28, %v4031_v42 }
 0x225   : > { %v6026_v24 = vpop.eup %6025  ;;  %4281 = vst [vmem:[%s7462_s9 + $0xc8] sm:$0xff] %v4245_v52  ;;  %6037 = vtanh.f32 %v4108_v18 }
 0x226   : > { %v6028_v27 = vpop.eup %6027  ;;  %v4244_v59 = vmul.f32 %v4208_v39, %v7558_v7  ;;  %v4211_v17 = vmul.f32 0.5, %v4175_v25  ;;  %v4174_v14 = vadd.f32 1.0, %v6026_v24  ;;  %6039 = vtanh.f32 %v4111_v31 }
 0x227   : > { %v4177_v16 = vadd.f32 1.0, %v6028_v27  ;;  %v4110_v9 = vmul.f32 0.5, %v4074_v12 }
 0x228   : > { %v6030_v29 = vpop.eup %6029  ;;  %4280 = vst [vmem:[%s7462_s9 + $0xc0] sm:$0xff] %v4244_v59  ;;  %v4247_v38 = vmul.f32 %v4211_v17, %v7567_v45  ;;  %v4210_v21 = vmul.f32 0.5, %v4174_v14 }
 0x229   : > { %v4213_v28 = vmul.f32 0.5, %v4177_v16  ;;  %v4176_v2 = vadd.f32 1.0, %v6030_v29  ;;  %6041 = vtanh.f32 %v4110_v9 }
 0x22a   : > { %v6032_v33 = vpop.eup %6031  ;;  %4283 = vst [vmem:[%s7462_s9 + $0xd8] sm:$0xff] %v4247_v38  ;;  %v4246_v7 = vmul.f32 %v4210_v21, %v7574_v48 }
 0x22b   : > { %v4249_v55 = vmul.f32 %v4213_v28, %v7577_v13  ;;  %v4212_v61 = vmul.f32 0.5, %v4176_v2  ;;  %v4179_v1 = vadd.f32 1.0, %v6032_v33 }
 0x22c   : > { %4282 = vst [vmem:[%s7462_s9 + $0xd0] sm:$0xff] %v4246_v7 }
 0x22d   : > { %v6034_v50 = vpop.eup %6033  ;;  %4285 = vst [vmem:[%s7462_s9 + $0xe8] sm:$0xff] %v4249_v55  ;;  %v4248_v45 = vmul.f32 %v4212_v61, %v7587_v32  ;;  %v4215_v30 = vmul.f32 0.5, %v4179_v1 }
 0x22e   : > { %v6036_v10 = vpop.eup %6035  ;;  %v4178_v23 = vadd.f32 1.0, %v6034_v50 }
 0x22f   : > { %4284 = vst [vmem:[%s7462_s9 + $0xe0] sm:$0xff] %v4248_v45  ;;  %v4251_v37 = vmul.f32 %v4215_v30, %v7594_v34  ;;  %v4181_v46 = vadd.f32 1.0, %v6036_v10 }
 0x230   : > { %v4214_v48 = vmul.f32 0.5, %v4178_v23 }
 0x231   : > { %4287 = vst [vmem:[%s7462_s9 + $0xf8] sm:$0xff] %v4251_v37  ;;  %v4217_v13 = vmul.f32 0.5, %v4181_v46 }
 0x232   : > { %v6038_v5 = vpop.eup %6037  ;;  %v4250_v53 = vmul.f32 %v4214_v48, %v7601_v22 }
 0x233   : > { %v6040_v19 = vpop.eup %6039  ;;  %v4253_v32 = vmul.f32 %v4217_v13, %v7604_v44  ;;  %v4180_v43 = vadd.f32 1.0, %v6038_v5 }
 0x234   : > { %4286 = vst [vmem:[%s7462_s9 + $0xf0] sm:$0xff] %v4250_v53  ;;  %v4183_v36 = vadd.f32 1.0, %v6040_v19 }
 0x235   : > { %4289 = vst [vmem:[%s7462_s9 + $0x108] sm:$0xff] %v4253_v32  ;;  %v4216_v34 = vmul.f32 0.5, %v4180_v43 }
 0x236   : > { %v6042_v4 = vpop.eup %6041  ;;  %v4219_v40 = vmul.f32 0.5, %v4183_v36 }
 0x237   : > { %v4252_v57 = vmul.f32 %v4216_v34, %v4072_v3  ;;  %v4182_v41 = vadd.f32 1.0, %v6042_v4 }
 0x238   : > { %v4255_v22 = vmul.f32 %v4219_v40, %v7618_v15 }
 0x239   : > { %4288 = vst [vmem:[%s7462_s9 + $0x100] sm:$0xff] %v4252_v57  ;;  %v4218_v11 = vmul.f32 0.5, %v4182_v41 }
 0x23a   : > { %4291 = vst [vmem:[%s7462_s9 + $0x118] sm:$0xff] %v4255_v22 }
 0x23b   : > { %v4254_v44 = vmul.f32 %v4218_v11, %v4074_v12 }
 0x23d   : > { %4290 = vst [vmem:[%s7462_s9 + $0x110] sm:$0xff] %v4254_v44 }
 0x23e   : > { %6056 = shalt.err (!%p6053_p5)
}
 0x23f   : > { %s6057_s29 = scalar_lea.hbm %s7650_s21, 4608  ;;  %s6061_s5 = scalar_lea.hbm %s7705_s3, 9216 }
 0x240   : > { %p6058_p6 = scmp.ne.s32.totalorder %s7650_s21, %s6057_s29  ;;  %p6062_p10 = scmp.lt.s32.totalorder %s7650_s21, %s7705_s3 }
 0x241   : > { %p6063_p11 = scmp.lt.s32.totalorder %s6061_s5, %s6057_s29 }
 0x242   : > { %p6059_p7 = pnand %p6058_p6, %p6184_p4 }
 0x243   : > { %p6064_p12 = por %p6063_p11, %p6062_p10 }
 0x244   : > { %p6060_p9 = pneg %p6059_p7 }
 0x246   : > { %p6065_p13 = pnand %p6064_p12, %p6060_p9 }
 0x248   : > { %6068 = shalt.err (!%p6065_p13)
}
 0x249   : > { %s6122_s8 = smov 128   ;;  %s6123_s9 = smov 8  }
 0x24a   : > { %5914 = dma.vmem_to_hbm [thread:$0]  (%p6184_p4), %s7652_s11, 4608, %s7650_s21, %s7657_s15, %s6122_s8, %s6122_s8, %s6123_s9  }
 0x24b PF: > { %p5920_p0 = scmp.ge.s32.totalorder %s6119_s17, 2  ;;  %s4324_s10 = sand.u32 1, %s6099_s12  }
 0x24c   : > { %s4325_s18 = scalar_lea.sflag [#allocation3], %s4324_s10 }
 0x24d   : > { %p5917_p1 = pnand %p5920_p0, %p6191_p8 }
 0x24f   : > { %p5918_p2 = pneg %p5917_p1 }
 0x251   : > { %6094 = dma.done.wait (%p5918_p2), %s4325_s18, 4608  }
 0x252   : > { %6096 = vsyncadd (%p5918_p2), %s4325_s18, 4294962688  ;;  %s16_s17 = sadd.s32 1, %s6119_s17   ;;  %s7708_s12 = smov %s6103_s13 }
 0x253   : > { %p13_p3 = scmp.ge.s32.totalorder %s16_s17, 4   ;;  %s7709_s13 = smov %s6107_s14 }
 0x254   : > { %s7710_s14 = smov %s6197_s25  ;;  %s7711_s15 = smov %s6115_s16 }
 0x255   : > { %s7712_s16 = smov %s7714_s20  ;;  %15 = sbr.rel (!%p13_p3) target bundleno = 4 (0x4), region = 82 }
 0x25a   :  { %4330 = vsyncpa [#allocation3], 1 }
 0x25b   :  { %4332 = vsyncpa [#allocation3 + $0x1], 1 }

</bundles_post_ra>
